<compile_context>
chip_gen: v7x
topology: tpu7x:2x2x1
jax: 0.10.0
libtpu: 0.0.40
codegen_flags: <defaults>
</compile_context>

<pallas_src>
import jax
import jax.numpy as jnp
from jax.experimental import pallas as pl
from jax.experimental.pallas import tpu as pltpu

_BN_EPS = 1e-5


# ---------------------------------------------------------------------------
# shared conv core (runs inside the kernels, pure VMEM value math)
# ---------------------------------------------------------------------------
def _conv3x3_store(xin, w_ref, o_ref, stats_ref):
    """3x3 'same' conv of xin (Ho, Wo, Cin) via a single K=9*Cin MXU matmul.

    Writes raw (pre-BN) conv output to o_ref[0] (f32) and per-channel
    [sum, sum-of-squares] over (Ho, Wo) to stats_ref[0] (shape (2, Cout)).
    """
    Ho, Wo, Cin = xin.shape
    Cout = o_ref.shape[-1]
    w = w_ref[...]                                   # (9*Cin, Cout), compute dtype
    x = xin.astype(w.dtype)

    # zero padding (padding=1) done in VMEM -- no padded HBM copy.
    zc = jnp.zeros((Ho, 1, Cin), x.dtype)
    xp = jnp.concatenate([zc, x, zc], axis=1)        # (Ho, Wo+2, Cin)
    zr = jnp.zeros((1, Wo + 2, Cin), x.dtype)
    xp = jnp.concatenate([zr, xp, zr], axis=0)       # (Ho+2, Wo+2, Cin)

    # im2col: one large-K contraction instead of 9 tiny-K matmuls.
    taps = [xp[dy:dy + Ho, dx:dx + Wo, :] for dy in range(3) for dx in range(3)]
    col = jnp.concatenate(taps, axis=-1).reshape(Ho * Wo, 9 * Cin)
    acc = jnp.dot(col, w, preferred_element_type=jnp.float32)    # (Ho*Wo, Cout) f32

    o_ref[0] = acc.reshape(Ho, Wo, Cout)
    s = jnp.sum(acc, axis=0, keepdims=True)          # (1, Cout)
    ss = jnp.sum(acc * acc, axis=0, keepdims=True)   # (1, Cout)
    stats_ref[0] = jnp.concatenate([s, ss], axis=0)  # (2, Cout)


# ---------------------------------------------------------------------------
# kernels
# ---------------------------------------------------------------------------
def _pool_conv_kernel(x_ref, w_ref, o_ref, stats_ref):
    # x_ref: (1, Ho, 2, Wo, 2*Cin) -- full-res image; pool-window rows are a major
    # dim, pool-window cols are folded into the lane dim (no sublane gather needed).
    c2 = x_ref.shape[-1]
    cin = c2 // 2
    top = x_ref[0, :, 0, :, :]                            # rows 2*ho
    bot = x_ref[0, :, 1, :, :]                            # rows 2*ho + 1
    m = jnp.maximum(top, bot)                             # (Ho, Wo, 2*Cin)
    pooled = jnp.maximum(m[:, :, :cin], m[:, :, cin:])    # (Ho, Wo, Cin)
    _conv3x3_store(pooled, w_ref, o_ref, stats_ref)


def _bnrelu_conv_kernel(x_ref, scale_ref, shift_ref, w_ref, o_ref, stats_ref):
    # x_ref: (1, Ho, Wo, Cin) raw conv output of the previous layer (f32).
    y = jnp.maximum(x_ref[0] * scale_ref[...] + shift_ref[...], 0.0)
    _conv3x3_store(y, w_ref, o_ref, stats_ref)


def _bnrelu_kernel(x_ref, scale_ref, shift_ref, o_ref):
    o_ref[...] = jnp.maximum(
        x_ref[...] * scale_ref[...] + shift_ref[...], 0.0
    ).astype(o_ref.dtype)


# ---------------------------------------------------------------------------
# pallas_call wrappers
# ---------------------------------------------------------------------------
def _compiler_params():
    return pltpu.CompilerParams(
        dimension_semantics=("parallel",),          # shards batch across v7x's 2 TCs
        vmem_limit_bytes=32 * 1024 * 1024,
    )


def _conv_cost(n, ho, wo, cin, cout, in_bytes):
    return pl.CostEstimate(
        flops=2 * n * ho * wo * 9 * cin * cout,
        transcendentals=0,
        bytes_accessed=int(in_bytes + 9 * cin * cout * 4
                           + n * ho * wo * cout * 4 + n * 2 * cout * 4),
    )


def pool_conv_raw(x_nhwc, w_flat):
    """Fused MaxPool2d(2) + 3x3 'same' conv. Returns raw f32 output + per-image stats."""
    N, H, W, Cin = x_nhwc.shape
    assert H % 2 == 0 and W % 2 == 0
    Ho, Wo = H // 2, W // 2
    Cout = w_flat.shape[-1]
    x6 = x_nhwc.reshape(N, Ho, 2, Wo, 2 * Cin)      # pure dim-split; no transpose/copy
    return pl.pallas_call(
        _pool_conv_kernel,
        out_shape=(jax.ShapeDtypeStruct((N, Ho, Wo, Cout), jnp.float32),
                   jax.ShapeDtypeStruct((N, 2, Cout), jnp.float32)),
        grid=(N,),
        in_specs=[
            pl.BlockSpec((1, Ho, 2, Wo, 2 * Cin), lambda n: (n, 0, 0, 0, 0)),
            pl.BlockSpec((9 * Cin, Cout), lambda n: (0, 0)),
        ],
        out_specs=(
            pl.BlockSpec((1, Ho, Wo, Cout), lambda n: (n, 0, 0, 0)),
            pl.BlockSpec((1, 2, Cout), lambda n: (n, 0, 0)),
        ),
        compiler_params=_compiler_params(),
        cost_estimate=_conv_cost(N, Ho, Wo, Cin, Cout,
                                 x_nhwc.size * x_nhwc.dtype.itemsize),
    )(x6, w_flat)


def bnrelu_conv_raw(raw, scale, shift, w_flat):
    """Fused (BN scale/shift + ReLU of previous layer) + 3x3 'same' conv."""
    N, Ho, Wo, Cin = raw.shape
    Cout = w_flat.shape[-1]
    return pl.pallas_call(
        _bnrelu_conv_kernel,
        out_shape=(jax.ShapeDtypeStruct((N, Ho, Wo, Cout), jnp.float32),
                   jax.ShapeDtypeStruct((N, 2, Cout), jnp.float32)),
        grid=(N,),
        in_specs=[
            pl.BlockSpec((1, Ho, Wo, Cin), lambda n: (n, 0, 0, 0)),
            pl.BlockSpec((1, Cin), lambda n: (0, 0)),
            pl.BlockSpec((1, Cin), lambda n: (0, 0)),
            pl.BlockSpec((9 * Cin, Cout), lambda n: (0, 0)),
        ],
        out_specs=(
            pl.BlockSpec((1, Ho, Wo, Cout), lambda n: (n, 0, 0, 0)),
            pl.BlockSpec((1, 2, Cout), lambda n: (n, 0, 0)),
        ),
        compiler_params=_compiler_params(),
        cost_estimate=_conv_cost(N, Ho, Wo, Cin, Cout, raw.size * 4),
    )(raw, scale, shift, w_flat)


def bnrelu_apply(raw, scale, shift, out_dtype):
    """Final folded BN scale/shift + ReLU."""
    N, Ho, Wo, C = raw.shape
    return pl.pallas_call(
        _bnrelu_kernel,
        out_shape=jax.ShapeDtypeStruct((N, Ho, Wo, C), out_dtype),
        grid=(N,),
        in_specs=[
            pl.BlockSpec((1, Ho, Wo, C), lambda n: (n, 0, 0, 0)),
            pl.BlockSpec((1, C), lambda n: (0, 0)),
            pl.BlockSpec((1, C), lambda n: (0, 0)),
        ],
        out_specs=pl.BlockSpec((1, Ho, Wo, C), lambda n: (n, 0, 0, 0)),
        compiler_params=_compiler_params(),
    )(raw, scale, shift)


def _bn_scale_shift(stats, gamma, beta, count):
    # stats: (N, 2, C) per-image [sum, sumsq] -> folded per-channel scale/shift.
    s = jnp.sum(stats[:, 0, :], axis=0)
    ss = jnp.sum(stats[:, 1, :], axis=0)
    mean = s / count
    var = jnp.maximum(ss / count - mean * mean, 0.0)     # biased var (training-mode BN)
    scale = gamma * jax.lax.rsqrt(var + _BN_EPS)
    shift = beta - mean * scale
    return scale.reshape(1, -1), shift.reshape(1, -1)


# ---------------------------------------------------------------------------
# down module: MaxPool2d(2) -> (conv3x3 -> BN -> ReLU) x 2
# ---------------------------------------------------------------------------
def down_forward(x_nchw, params, compute_dtype=jnp.float32):
    """Forward of `down(in_ch, out_ch)` with training-mode BatchNorm statistics.

    `compute_dtype` controls MXU operand precision (bf16 is a v6e/v7x throughput
    win); accumulation and all BN statistics stay f32. Default f32 matches PyTorch.
    """
    x = jnp.transpose(x_nchw, (0, 2, 3, 1))              # NCHW -> NHWC (C on lanes)
    N, H, W, Cin = x.shape
    Cout = params["w1"].shape[-1]
    Ho, Wo = H // 2, W // 2
    count = float(N * Ho * Wo)

    w1 = params["w1"].reshape(9 * Cin, Cout).astype(compute_dtype)
    w2 = params["w2"].reshape(9 * Cout, Cout).astype(compute_dtype)
    # conv biases are intentionally NOT applied: a per-channel constant before
    # training-mode BatchNorm is exactly cancelled by the mean subtraction.

    raw1, st1 = pool_conv_raw(x.astype(compute_dtype), w1)
    sc1, sh1 = _bn_scale_shift(st1, params["g1"], params["beta1"], count)

    raw2, st2 = bnrelu_conv_raw(raw1, sc1, sh1, w2)
    sc2, sh2 = _bn_scale_shift(st2, params["g2"], params["beta2"], count)

    y = bnrelu_apply(raw2, sc2, sh2, x_nchw.dtype)
    return jnp.transpose(y, (0, 3, 1, 2))                # NHWC -> NCHW


def init_params(key, in_ch, out_ch):
    """Deterministic synthetic init (PyTorch-like uniform bounds for conv,
    gamma=1 / beta=0 for BatchNorm). Conv biases kept for parity but unused
    (they cancel under training-mode BN)."""
    k1, k2, k3, k4 = jax.random.split(key, 4)

    def conv_init(kw, kb, cin, cout):
        bound = 1.0 / float(cin * 9) ** 0.5
        w = jax.random.uniform(kw, (3, 3, cin, cout), jnp.float32, -bound, bound)
        b = jax.random.uniform(kb, (cout,), jnp.float32, -bound, bound)
        return w, b

    w1, b1 = conv_init(k1, k2, in_ch, out_ch)
    w2, b2 = conv_init(k3, k4, out_ch, out_ch)
    return {
        "w1": w1, "b1": b1,
        "g1": jnp.ones((out_ch,), jnp.float32), "beta1": jnp.zeros((out_ch,), jnp.float32),
        "w2": w2, "b2": b2,
        "g2": jnp.ones((out_ch,), jnp.float32), "beta2": jnp.zeros((out_ch,), jnp.float32),
    }


def _reference_forward(x_nchw, params):
    """Pure-JAX reference (same math, no Pallas) for a numerical sanity check."""
    def conv(h, w_hwio):
        return jax.lax.conv_general_dilated(
            h, w_hwio, window_strides=(1, 1), padding="SAME",
            dimension_numbers=("NHWC", "HWIO", "NHWC"))

    def bn_relu(h, g, b):
        mean = jnp.mean(h, axis=(0, 1, 2))
        var = jnp.mean((h - mean) ** 2, axis=(0, 1, 2))
        return jnp.maximum((h - mean) * jax.lax.rsqrt(var + _BN_EPS) * g + b, 0.0)

    xh = jnp.transpose(x_nchw, (0, 2, 3, 1))
    p = jax.lax.reduce_window(xh, -jnp.inf, jax.lax.max,
                              (1, 2, 2, 1), (1, 2, 2, 1), "VALID")
    h = bn_relu(conv(p, params["w1"]), params["g1"], params["beta1"])
    h = bn_relu(conv(h, params["w2"]), params["g2"], params["beta2"])
    return jnp.transpose(h, (0, 3, 1, 2))


if __name__ == "__main__":
    key = jax.random.PRNGKey(0)
    kx, kp = jax.random.split(key)

    in_ch, out_ch = 4, 8
    x = jax.random.normal(kx, (2, in_ch, 16, 16), jnp.float32)   # NCHW
    params = init_params(kp, in_ch, out_ch)

    fwd = jax.jit(down_forward)
    y = jax.block_until_ready(fwd(x, params))

    assert y.shape == (2, out_ch, 8, 8), y.shape
    assert bool(jnp.all(y >= 0.0))            # ReLU output
    assert bool(jnp.all(jnp.isfinite(y)))

    y_ref = _reference_forward(x, params)
    assert bool(jnp.allclose(y, y_ref, atol=2e-3, rtol=2e-3)), "mismatch vs JAX reference"

    print("KERNEL_OK")
</pallas_src>

<mosaic_0001>
module attributes {stable_mosaic.version = 11 : i64} {
  func.func @_pool_conv_kernel(%arg0: i32, %arg1: memref<1x8x2x8x8xf32, #tpu.memory_space<vmem>>, %arg2: memref<36x8xf32, #tpu.memory_space<vmem>>, %arg3: memref<1x8x8x8xf32, #tpu.memory_space<vmem>>, %arg4: memref<1x2x8xf32, #tpu.memory_space<vmem>>) attributes {dimension_semantics = [#tpu.dimension_semantics<parallel>], iteration_bounds = array<i64: 2>, scalar_prefetch = 0 : i64, scratch_operands = 0 : i64, tpu.core_type = #tpu.core_type<tc>, window_params = [{transform_indices = @transform_0, window_bounds = array<i64: 1, 8, 2, 8, 8>}, {pipeline_mode = #tpu.pipeline_mode<synchronous>, transform_indices = @transform_1, window_bounds = array<i64: 36, 8>}, {transform_indices = @transform_2, window_bounds = array<i64: 1, 8, 8, 8>}, {transform_indices = @transform_3, window_bounds = array<i64: 1, 2, 8>}]} {
    %c0 = arith.constant 0 : index
    %c0_0 = arith.constant 0 : index
    %c0_1 = arith.constant 0 : index
    %c0_2 = arith.constant 0 : index
    %c0_3 = arith.constant 0 : index
    %0 = vector.load %arg1[%c0, %c0_0, %c0_1, %c0_2, %c0_3] : memref<1x8x2x8x8xf32, #tpu.memory_space<vmem>>, vector<1x8x1x8x8xf32>
    %1 = vector.shape_cast %0 : vector<1x8x1x8x8xf32> to vector<8x8x8xf32>
    %c0_4 = arith.constant 0 : index
    %c0_5 = arith.constant 0 : index
    %c1 = arith.constant 1 : index
    %c0_6 = arith.constant 0 : index
    %c0_7 = arith.constant 0 : index
    %2 = vector.load %arg1[%c0_4, %c0_5, %c1, %c0_6, %c0_7] : memref<1x8x2x8x8xf32, #tpu.memory_space<vmem>>, vector<1x8x1x8x8xf32>
    %3 = vector.shape_cast %2 : vector<1x8x1x8x8xf32> to vector<8x8x8xf32>
    %4 = arith.maximumf %1, %3 : vector<8x8x8xf32>
    %5 = vector.extract_strided_slice %4 {offsets = [0, 0, 0], sizes = [8, 8, 4], strides = [1, 1, 1]} : vector<8x8x8xf32> to vector<8x8x4xf32>
    %6 = vector.extract_strided_slice %4 {offsets = [0, 0, 4], sizes = [8, 8, 4], strides = [1, 1, 1]} : vector<8x8x8xf32> to vector<8x8x4xf32>
    %7 = arith.maximumf %5, %6 : vector<8x8x4xf32>
    %c0_8 = arith.constant 0 : index
    %c0_9 = arith.constant 0 : index
    %8 = vector.load %arg2[%c0_8, %c0_9] : memref<36x8xf32, #tpu.memory_space<vmem>>, vector<36x8xf32>
    %cst = arith.constant 0.000000e+00 : f32
    %9 = vector.broadcast %cst : f32 to vector<8x1x4xf32>
    %10 = tpu.concatenate %9, %7, %9 in 1 : vector<8x1x4xf32>, vector<8x8x4xf32>, vector<8x1x4xf32> -> vector<8x10x4xf32>
    %cst_10 = arith.constant 0.000000e+00 : f32
    %11 = vector.broadcast %cst_10 : f32 to vector<1x10x4xf32>
    %12 = tpu.concatenate %11, %10, %11 in 0 : vector<1x10x4xf32>, vector<8x10x4xf32>, vector<1x10x4xf32> -> vector<10x10x4xf32>
    %13 = vector.extract_strided_slice %12 {offsets = [0, 0, 0], sizes = [8, 8, 4], strides = [1, 1, 1]} : vector<10x10x4xf32> to vector<8x8x4xf32>
    %14 = vector.extract_strided_slice %12 {offsets = [0, 1, 0], sizes = [8, 8, 4], strides = [1, 1, 1]} : vector<10x10x4xf32> to vector<8x8x4xf32>
    %15 = vector.extract_strided_slice %12 {offsets = [0, 2, 0], sizes = [8, 8, 4], strides = [1, 1, 1]} : vector<10x10x4xf32> to vector<8x8x4xf32>
    %16 = vector.extract_strided_slice %12 {offsets = [1, 0, 0], sizes = [8, 8, 4], strides = [1, 1, 1]} : vector<10x10x4xf32> to vector<8x8x4xf32>
    %17 = vector.extract_strided_slice %12 {offsets = [1, 1, 0], sizes = [8, 8, 4], strides = [1, 1, 1]} : vector<10x10x4xf32> to vector<8x8x4xf32>
    %18 = vector.extract_strided_slice %12 {offsets = [1, 2, 0], sizes = [8, 8, 4], strides = [1, 1, 1]} : vector<10x10x4xf32> to vector<8x8x4xf32>
    %19 = vector.extract_strided_slice %12 {offsets = [2, 0, 0], sizes = [8, 8, 4], strides = [1, 1, 1]} : vector<10x10x4xf32> to vector<8x8x4xf32>
    %20 = vector.extract_strided_slice %12 {offsets = [2, 1, 0], sizes = [8, 8, 4], strides = [1, 1, 1]} : vector<10x10x4xf32> to vector<8x8x4xf32>
    %21 = vector.extract_strided_slice %12 {offsets = [2, 2, 0], sizes = [8, 8, 4], strides = [1, 1, 1]} : vector<10x10x4xf32> to vector<8x8x4xf32>
    %22 = tpu.concatenate %13, %14, %15, %16, %17, %18, %19, %20, %21 in 2 : vector<8x8x4xf32>, vector<8x8x4xf32>, vector<8x8x4xf32>, vector<8x8x4xf32>, vector<8x8x4xf32>, vector<8x8x4xf32>, vector<8x8x4xf32>, vector<8x8x4xf32>, vector<8x8x4xf32> -> vector<8x8x36xf32>
    %23 = vector.shape_cast %22 : vector<8x8x36xf32> to vector<64x36xf32>
    %cst_11 = arith.constant dense<0.000000e+00> : vector<64x8xf32>
    %24 = tpu.matmul %23, %8, %cst_11 {dimension_numbers = #tpu.dot_dimension_numbers<[1], [0], [0], [1], [0, 0, 1, 1], [], []>} : vector<64x36xf32>, vector<36x8xf32>, vector<64x8xf32> -> vector<64x8xf32>
    %25 = vector.shape_cast %24 : vector<64x8xf32> to vector<8x8x8xf32>
    %c0_12 = arith.constant 0 : index
    %c0_13 = arith.constant 0 : index
    %c0_14 = arith.constant 0 : index
    %c0_15 = arith.constant 0 : index
    %26 = vector.load %arg3[%c0_12, %c0_13, %c0_14, %c0_15] : memref<1x8x8x8xf32, #tpu.memory_space<vmem>>, vector<1x8x8x8xf32>
    %27 = vector.shape_cast %26 : vector<1x8x8x8xf32> to vector<8x8x8xf32>
    %28 = vector.shape_cast %25 : vector<8x8x8xf32> to vector<1x8x8x8xf32>
    tpu.vector_store %arg3[%c0_12, %c0_13, %c0_14, %c0_15], %28 {strides = array<i32>} : memref<1x8x8x8xf32, #tpu.memory_space<vmem>>, vector<1x8x8x8xf32>,
    %cst_16 = arith.constant dense<0.000000e+00> : vector<8xf32>
    %29 = vector.multi_reduction <add>, %24, %cst_16 [0] : vector<64x8xf32> to vector<8xf32>
    %30 = vector.shape_cast %29 : vector<8xf32> to vector<1x8xf32>
    %31 = arith.mulf %24, %24 : vector<64x8xf32>
    %cst_17 = arith.constant dense<0.000000e+00> : vector<8xf32>
    %32 = vector.multi_reduction <add>, %31, %cst_17 [0] : vector<64x8xf32> to vector<8xf32>
    %33 = vector.shape_cast %32 : vector<8xf32> to vector<1x8xf32>
    %34 = tpu.concatenate %30, %33 in 0 : vector<1x8xf32>, vector<1x8xf32> -> vector<2x8xf32>
    %c0_18 = arith.constant 0 : index
    %c0_19 = arith.constant 0 : index
    %c0_20 = arith.constant 0 : index
    %35 = vector.load %arg4[%c0_18, %c0_19, %c0_20] : memref<1x2x8xf32, #tpu.memory_space<vmem>>, vector<1x2x8xf32>
    %36 = vector.shape_cast %35 : vector<1x2x8xf32> to vector<2x8xf32>
    %37 = vector.shape_cast %34 : vector<2x8xf32> to vector<1x2x8xf32>
    tpu.vector_store %arg4[%c0_18, %c0_19, %c0_20], %37 {strides = array<i32>} : memref<1x2x8xf32, #tpu.memory_space<vmem>>, vector<1x2x8xf32>,
    return
  }
  func.func @transform_0(%arg0: i32) -> (i32, i32, i32, i32, i32) {
    %c0_i32 = arith.constant 0 : i32
    %c0_i32_0 = arith.constant 0 : i32
    %c0_i32_1 = arith.constant 0 : i32
    %c0_i32_2 = arith.constant 0 : i32
    %c0_i32_3 = arith.constant 0 : i32
    return %arg0, %c0_i32, %c0_i32_0, %c0_i32_1, %c0_i32_2 : i32, i32, i32, i32, i32
  }
  func.func @transform_1(%arg0: i32) -> (i32, i32) {
    %c0_i32 = arith.constant 0 : i32
    %c0_i32_0 = arith.constant 0 : i32
    %c0_i32_1 = arith.constant 0 : i32
    return %c0_i32, %c0_i32_0 : i32, i32
  }
  func.func @transform_2(%arg0: i32) -> (i32, i32, i32, i32) {
    %c0_i32 = arith.constant 0 : i32
    %c0_i32_0 = arith.constant 0 : i32
    %c0_i32_1 = arith.constant 0 : i32
    %c0_i32_2 = arith.constant 0 : i32
    return %arg0, %c0_i32, %c0_i32_0, %c0_i32_1 : i32, i32, i32, i32
  }
  func.func @transform_3(%arg0: i32) -> (i32, i32, i32) {
    %c0_i32 = arith.constant 0 : i32
    %c0_i32_0 = arith.constant 0 : i32
    %c0_i32_1 = arith.constant 0 : i32
    return %arg0, %c0_i32, %c0_i32_0 : i32, i32, i32
  }
}

module attributes {stable_mosaic.version = 11 : i64} {
  func.func @_bnrelu_kernel(%arg0: i32, %arg1: memref<1x8x8x8xf32, #tpu.memory_space<vmem>>, %arg2: memref<1x8xf32, #tpu.memory_space<vmem>>, %arg3: memref<1x8xf32, #tpu.memory_space<vmem>>, %arg4: memref<1x8x8x8xf32, #tpu.memory_space<vmem>>) attributes {dimension_semantics = [#tpu.dimension_semantics<parallel>], iteration_bounds = array<i64: 2>, scalar_prefetch = 0 : i64, scratch_operands = 0 : i64, tpu.core_type = #tpu.core_type<tc>, window_params = [{transform_indices = @transform_0, window_bounds = array<i64: 1, 8, 8, 8>}, {pipeline_mode = #tpu.pipeline_mode<synchronous>, transform_indices = @transform_1, window_bounds = array<i64: 1, 8>}, {pipeline_mode = #tpu.pipeline_mode<synchronous>, transform_indices = @transform_2, window_bounds = array<i64: 1, 8>}, {transform_indices = @transform_3, window_bounds = array<i64: 1, 8, 8, 8>}]} {
    %c0 = arith.constant 0 : index
    %c0_0 = arith.constant 0 : index
    %c0_1 = arith.constant 0 : index
    %c0_2 = arith.constant 0 : index
    %0 = vector.load %arg1[%c0, %c0_0, %c0_1, %c0_2] : memref<1x8x8x8xf32, #tpu.memory_space<vmem>>, vector<1x8x8x8xf32>
    %c0_3 = arith.constant 0 : index
    %c0_4 = arith.constant 0 : index
    %1 = vector.load %arg2[%c0_3, %c0_4] : memref<1x8xf32, #tpu.memory_space<vmem>>, vector<1x8xf32>
    %2 = vector.shape_cast %1 : vector<1x8xf32> to vector<1x1x1x8xf32>
    %3 = vector.broadcast %2 : vector<1x1x1x8xf32> to vector<1x8x8x8xf32>
    %4 = arith.mulf %0, %3 : vector<1x8x8x8xf32>
    %c0_5 = arith.constant 0 : index
    %c0_6 = arith.constant 0 : index
    %5 = vector.load %arg3[%c0_5, %c0_6] : memref<1x8xf32, #tpu.memory_space<vmem>>, vector<1x8xf32>
    %6 = vector.shape_cast %5 : vector<1x8xf32> to vector<1x1x1x8xf32>
    %7 = vector.broadcast %6 : vector<1x1x1x8xf32> to vector<1x8x8x8xf32>
    %8 = arith.addf %4, %7 : vector<1x8x8x8xf32>
    %cst = arith.constant 0.000000e+00 : f32
    %9 = vector.broadcast %cst : f32 to vector<1x8x8x8xf32>
    %10 = arith.maximumf %8, %9 : vector<1x8x8x8xf32>
    %c0_7 = arith.constant 0 : index
    %c0_8 = arith.constant 0 : index
    %c0_9 = arith.constant 0 : index
    %c0_10 = arith.constant 0 : index
    %11 = vector.load %arg4[%c0_7, %c0_8, %c0_9, %c0_10] : memref<1x8x8x8xf32, #tpu.memory_space<vmem>>, vector<1x8x8x8xf32>
    tpu.vector_store %arg4[%c0_7, %c0_8, %c0_9, %c0_10], %10 {strides = array<i32>} : memref<1x8x8x8xf32, #tpu.memory_space<vmem>>, vector<1x8x8x8xf32>,
    return
  }
  func.func @transform_0(%arg0: i32) -> (i32, i32, i32, i32) {
    %c0_i32 = arith.constant 0 : i32
    %c0_i32_0 = arith.constant 0 : i32
    %c0_i32_1 = arith.constant 0 : i32
    %c0_i32_2 = arith.constant 0 : i32
    return %arg0, %c0_i32, %c0_i32_0, %c0_i32_1 : i32, i32, i32, i32
  }
  func.func @transform_1(%arg0: i32) -> (i32, i32) {
    %c0_i32 = arith.constant 0 : i32
    %c0_i32_0 = arith.constant 0 : i32
    %c0_i32_1 = arith.constant 0 : i32
    return %c0_i32, %c0_i32_0 : i32, i32
  }
  func.func @transform_2(%arg0: i32) -> (i32, i32) {
    %c0_i32 = arith.constant 0 : i32
    %c0_i32_0 = arith.constant 0 : i32
    %c0_i32_1 = arith.constant 0 : i32
    return %c0_i32, %c0_i32_0 : i32, i32
  }
  func.func @transform_3(%arg0: i32) -> (i32, i32, i32, i32) {
    %c0_i32 = arith.constant 0 : i32
    %c0_i32_0 = arith.constant 0 : i32
    %c0_i32_1 = arith.constant 0 : i32
    %c0_i32_2 = arith.constant 0 : i32
    return %arg0, %c0_i32, %c0_i32_0, %c0_i32_1 : i32, i32, i32, i32
  }
}

module attributes {stable_mosaic.version = 11 : i64} {
  func.func @_bnrelu_conv_kernel(%arg0: i32, %arg1: memref<1x8x8x8xf32, #tpu.memory_space<vmem>>, %arg2: memref<1x8xf32, #tpu.memory_space<vmem>>, %arg3: memref<1x8xf32, #tpu.memory_space<vmem>>, %arg4: memref<72x8xf32, #tpu.memory_space<vmem>>, %arg5: memref<1x8x8x8xf32, #tpu.memory_space<vmem>>, %arg6: memref<1x2x8xf32, #tpu.memory_space<vmem>>) attributes {dimension_semantics = [#tpu.dimension_semantics<parallel>], iteration_bounds = array<i64: 2>, scalar_prefetch = 0 : i64, scratch_operands = 0 : i64, tpu.core_type = #tpu.core_type<tc>, window_params = [{transform_indices = @transform_0, window_bounds = array<i64: 1, 8, 8, 8>}, {pipeline_mode = #tpu.pipeline_mode<synchronous>, transform_indices = @transform_1, window_bounds = array<i64: 1, 8>}, {pipeline_mode = #tpu.pipeline_mode<synchronous>, transform_indices = @transform_2, window_bounds = array<i64: 1, 8>}, {pipeline_mode = #tpu.pipeline_mode<synchronous>, transform_indices = @transform_3, window_bounds = array<i64: 72, 8>}, {transform_indices = @transform_4, window_bounds = array<i64: 1, 8, 8, 8>}, {transform_indices = @transform_5, window_bounds = array<i64: 1, 2, 8>}]} {
    %c0 = arith.constant 0 : index
    %c0_0 = arith.constant 0 : index
    %c0_1 = arith.constant 0 : index
    %c0_2 = arith.constant 0 : index
    %0 = vector.load %arg1[%c0, %c0_0, %c0_1, %c0_2] : memref<1x8x8x8xf32, #tpu.memory_space<vmem>>, vector<1x8x8x8xf32>
    %1 = vector.shape_cast %0 : vector<1x8x8x8xf32> to vector<8x8x8xf32>
    %c0_3 = arith.constant 0 : index
    %c0_4 = arith.constant 0 : index
    %2 = vector.load %arg2[%c0_3, %c0_4] : memref<1x8xf32, #tpu.memory_space<vmem>>, vector<1x8xf32>
    %3 = vector.shape_cast %2 : vector<1x8xf32> to vector<1x1x8xf32>
    %4 = vector.broadcast %3 : vector<1x1x8xf32> to vector<8x8x8xf32>
    %5 = arith.mulf %1, %4 : vector<8x8x8xf32>
    %c0_5 = arith.constant 0 : index
    %c0_6 = arith.constant 0 : index
    %6 = vector.load %arg3[%c0_5, %c0_6] : memref<1x8xf32, #tpu.memory_space<vmem>>, vector<1x8xf32>
    %7 = vector.shape_cast %6 : vector<1x8xf32> to vector<1x1x8xf32>
    %8 = vector.broadcast %7 : vector<1x1x8xf32> to vector<8x8x8xf32>
    %9 = arith.addf %5, %8 : vector<8x8x8xf32>
    %cst = arith.constant 0.000000e+00 : f32
    %10 = vector.broadcast %cst : f32 to vector<8x8x8xf32>
    %11 = arith.maximumf %9, %10 : vector<8x8x8xf32>
    %c0_7 = arith.constant 0 : index
    %c0_8 = arith.constant 0 : index
    %12 = vector.load %arg4[%c0_7, %c0_8] : memref<72x8xf32, #tpu.memory_space<vmem>>, vector<72x8xf32>
    %cst_9 = arith.constant 0.000000e+00 : f32
    %13 = vector.broadcast %cst_9 : f32 to vector<8x1x8xf32>
    %14 = tpu.concatenate %13, %11, %13 in 1 : vector<8x1x8xf32>, vector<8x8x8xf32>, vector<8x1x8xf32> -> vector<8x10x8xf32>
    %cst_10 = arith.constant 0.000000e+00 : f32
    %15 = vector.broadcast %cst_10 : f32 to vector<1x10x8xf32>
    %16 = tpu.concatenate %15, %14, %15 in 0 : vector<1x10x8xf32>, vector<8x10x8xf32>, vector<1x10x8xf32> -> vector<10x10x8xf32>
    %17 = vector.extract_strided_slice %16 {offsets = [0, 0, 0], sizes = [8, 8, 8], strides = [1, 1, 1]} : vector<10x10x8xf32> to vector<8x8x8xf32>
    %18 = vector.extract_strided_slice %16 {offsets = [0, 1, 0], sizes = [8, 8, 8], strides = [1, 1, 1]} : vector<10x10x8xf32> to vector<8x8x8xf32>
    %19 = vector.extract_strided_slice %16 {offsets = [0, 2, 0], sizes = [8, 8, 8], strides = [1, 1, 1]} : vector<10x10x8xf32> to vector<8x8x8xf32>
    %20 = vector.extract_strided_slice %16 {offsets = [1, 0, 0], sizes = [8, 8, 8], strides = [1, 1, 1]} : vector<10x10x8xf32> to vector<8x8x8xf32>
    %21 = vector.extract_strided_slice %16 {offsets = [1, 1, 0], sizes = [8, 8, 8], strides = [1, 1, 1]} : vector<10x10x8xf32> to vector<8x8x8xf32>
    %22 = vector.extract_strided_slice %16 {offsets = [1, 2, 0], sizes = [8, 8, 8], strides = [1, 1, 1]} : vector<10x10x8xf32> to vector<8x8x8xf32>
    %23 = vector.extract_strided_slice %16 {offsets = [2, 0, 0], sizes = [8, 8, 8], strides = [1, 1, 1]} : vector<10x10x8xf32> to vector<8x8x8xf32>
    %24 = vector.extract_strided_slice %16 {offsets = [2, 1, 0], sizes = [8, 8, 8], strides = [1, 1, 1]} : vector<10x10x8xf32> to vector<8x8x8xf32>
    %25 = vector.extract_strided_slice %16 {offsets = [2, 2, 0], sizes = [8, 8, 8], strides = [1, 1, 1]} : vector<10x10x8xf32> to vector<8x8x8xf32>
    %26 = tpu.concatenate %17, %18, %19, %20, %21, %22, %23, %24, %25 in 2 : vector<8x8x8xf32>, vector<8x8x8xf32>, vector<8x8x8xf32>, vector<8x8x8xf32>, vector<8x8x8xf32>, vector<8x8x8xf32>, vector<8x8x8xf32>, vector<8x8x8xf32>, vector<8x8x8xf32> -> vector<8x8x72xf32>
    %27 = vector.shape_cast %26 : vector<8x8x72xf32> to vector<64x72xf32>
    %cst_11 = arith.constant dense<0.000000e+00> : vector<64x8xf32>
    %28 = tpu.matmul %27, %12, %cst_11 {dimension_numbers = #tpu.dot_dimension_numbers<[1], [0], [0], [1], [0, 0, 1, 1], [], []>} : vector<64x72xf32>, vector<72x8xf32>, vector<64x8xf32> -> vector<64x8xf32>
    %29 = vector.shape_cast %28 : vector<64x8xf32> to vector<8x8x8xf32>
    %c0_12 = arith.constant 0 : index
    %c0_13 = arith.constant 0 : index
    %c0_14 = arith.constant 0 : index
    %c0_15 = arith.constant 0 : index
    %30 = vector.load %arg5[%c0_12, %c0_13, %c0_14, %c0_15] : memref<1x8x8x8xf32, #tpu.memory_space<vmem>>, vector<1x8x8x8xf32>
    %31 = vector.shape_cast %30 : vector<1x8x8x8xf32> to vector<8x8x8xf32>
    %32 = vector.shape_cast %29 : vector<8x8x8xf32> to vector<1x8x8x8xf32>
    tpu.vector_store %arg5[%c0_12, %c0_13, %c0_14, %c0_15], %32 {strides = array<i32>} : memref<1x8x8x8xf32, #tpu.memory_space<vmem>>, vector<1x8x8x8xf32>,
    %cst_16 = arith.constant dense<0.000000e+00> : vector<8xf32>
    %33 = vector.multi_reduction <add>, %28, %cst_16 [0] : vector<64x8xf32> to vector<8xf32>
    %34 = vector.shape_cast %33 : vector<8xf32> to vector<1x8xf32>
    %35 = arith.mulf %28, %28 : vector<64x8xf32>
    %cst_17 = arith.constant dense<0.000000e+00> : vector<8xf32>
    %36 = vector.multi_reduction <add>, %35, %cst_17 [0] : vector<64x8xf32> to vector<8xf32>
    %37 = vector.shape_cast %36 : vector<8xf32> to vector<1x8xf32>
    %38 = tpu.concatenate %34, %37 in 0 : vector<1x8xf32>, vector<1x8xf32> -> vector<2x8xf32>
    %c0_18 = arith.constant 0 : index
    %c0_19 = arith.constant 0 : index
    %c0_20 = arith.constant 0 : index
    %39 = vector.load %arg6[%c0_18, %c0_19, %c0_20] : memref<1x2x8xf32, #tpu.memory_space<vmem>>, vector<1x2x8xf32>
    %40 = vector.shape_cast %39 : vector<1x2x8xf32> to vector<2x8xf32>
    %41 = vector.shape_cast %38 : vector<2x8xf32> to vector<1x2x8xf32>
    tpu.vector_store %arg6[%c0_18, %c0_19, %c0_20], %41 {strides = array<i32>} : memref<1x2x8xf32, #tpu.memory_space<vmem>>, vector<1x2x8xf32>,
    return
  }
  func.func @transform_0(%arg0: i32) -> (i32, i32, i32, i32) {
    %c0_i32 = arith.constant 0 : i32
    %c0_i32_0 = arith.constant 0 : i32
    %c0_i32_1 = arith.constant 0 : i32
    %c0_i32_2 = arith.constant 0 : i32
    return %arg0, %c0_i32, %c0_i32_0, %c0_i32_1 : i32, i32, i32, i32
  }
  func.func @transform_1(%arg0: i32) -> (i32, i32) {
    %c0_i32 = arith.constant 0 : i32
    %c0_i32_0 = arith.constant 0 : i32
    %c0_i32_1 = arith.constant 0 : i32
    return %c0_i32, %c0_i32_0 : i32, i32
  }
  func.func @transform_2(%arg0: i32) -> (i32, i32) {
    %c0_i32 = arith.constant 0 : i32
    %c0_i32_0 = arith.constant 0 : i32
    %c0_i32_1 = arith.constant 0 : i32
    return %c0_i32, %c0_i32_0 : i32, i32
  }
  func.func @transform_3(%arg0: i32) -> (i32, i32) {
    %c0_i32 = arith.constant 0 : i32
    %c0_i32_0 = arith.constant 0 : i32
    %c0_i32_1 = arith.constant 0 : i32
    return %c0_i32, %c0_i32_0 : i32, i32
  }
  func.func @transform_4(%arg0: i32) -> (i32, i32, i32, i32) {
    %c0_i32 = arith.constant 0 : i32
    %c0_i32_0 = arith.constant 0 : i32
    %c0_i32_1 = arith.constant 0 : i32
    %c0_i32_2 = arith.constant 0 : i32
    return %arg0, %c0_i32, %c0_i32_0, %c0_i32_1 : i32, i32, i32, i32
  }
  func.func @transform_5(%arg0: i32) -> (i32, i32, i32) {
    %c0_i32 = arith.constant 0 : i32
    %c0_i32_0 = arith.constant 0 : i32
    %c0_i32_1 = arith.constant 0 : i32
    return %arg0, %c0_i32, %c0_i32_0 : i32, i32, i32
  }
}

</mosaic_0001>

<bundles_post_ra>
// kernel: down_forward.5
= control target key start
LH: loop header
LB: loop body
LE: loop exit
PB: predicated region body
PF: predicated region fallthrough
CT: control target
= control target key end

     0   :  { %s332_s12 = smov 0   ;;  %s363_s0 = inlined_call_operand.vmem [shape: f32[2,8,8,8], index: 0, kind: input, shape index: {}]   ;;  %s364_s1 = inlined_call_operand.vmem [shape: f32[1,8], index: 1, kind: input, shape index: {}]   ;;  %s365_s2 = inlined_call_operand.vmem [shape: f32[1,8], index: 2, kind: input, shape index: {}]   ;;  %s366_s3 = inlined_call_operand.vmem [shape: f32[2,8,8,8], index: 3, kind: output, shape index: {}]  }
   0x1 LB: > { %s281_s13 = sadd.s32 4294967295, %s310_s12   ;;  %p285_p0 = scmp.ge.s32.totalorder %s310_s12, 1  ;;  %s310_s12 = sphi %s332_s12, %s13_s12  }
   0x2   : > { %p137_p1 = scmp.lt.s32.totalorder %s310_s12, 3 }
   0x4   : > { %p138_p2 = pnand %p285_p0, %p137_p1 }
   0x5   : > { %p161_p3 = scmp.lt.s32.totalorder (!%p138_p2), %s281_s13, 1  ;;  %v290_v0 = vld [vmem:[%s364_s1] ss:$0 sm:$0xff] (!%p138_p2)  ;;  %vm217_vm0 = vcmask (!%p138_p2), 64512  }
   0x6   : > { %141 = sbr.rel (%p138_p2) target bundleno = 27 (0x1b), region = 32  ;;  %v291_v1 = vld [vmem:[%s365_s2] ss:$0 sm:$0xff] (!%p138_p2) }
   0xd   : > { %s368_s13 = smov (!%p161_p3, %s281_s13), 1 }
   0xe   : > { %s294_s14 = sshll.u32 %s368_s13, 6 }
   0xf   : > { %s165_s19 = scalar_lea.vmem %s363_s0, %s294_s14  ;;  %s170_s24 = scalar_lea.vmem %s366_s3, %s294_s14 }
  0x10   : > { %v171_v2 = vld [vmem:[%s165_s19] sm:$0xff]  ;;  %v172_v3 = vld [vmem:[%s165_s19 + $0x8] sm:$0xff]  ;;  %v173_v4 = vld [vmem:[%s165_s19 + $0x10] sm:$0xff] }
  0x11   : > { %v186_v5 = vmul.f32 %v290_v0, %v171_v2  ;;  %v187_v6 = vmul.f32 %v290_v0, %v172_v3  ;;  %v188_v7 = vmul.f32 %v290_v0, %v173_v4  ;;  %v174_v8 = vld [vmem:[%s165_s19 + $0x18] sm:$0xff]  ;;  %v175_v9 = vld [vmem:[%s165_s19 + $0x20] sm:$0xff]  ;;  %v176_v10 = vld [vmem:[%s165_s19 + $0x28] sm:$0xff] }
  0x12   : > { %v189_v11 = vmul.f32 %v290_v0, %v174_v8  ;;  %v190_v12 = vmul.f32 %v290_v0, %v175_v9  ;;  %v191_v13 = vmul.f32 %v290_v0, %v176_v10  ;;  %v177_v14 = vld [vmem:[%s165_s19 + $0x30] sm:$0xff]  ;;  %v178_v15 = vld [vmem:[%s165_s19 + $0x38] sm:$0xff] }
  0x13   : > { %v201_v16 = vadd.f32 %v291_v1, %v186_v5  ;;  %v202_v17 = vadd.f32 %v291_v1, %v187_v6  ;;  %v203_v18 = vadd.f32 %v291_v1, %v188_v7  ;;  %v192_v19 = vmul.f32 %v290_v0, %v177_v14 }
  0x14   : > { %v204_v20 = vadd.f32 %v291_v1, %v189_v11  ;;  %v205_v21 = vadd.f32 %v291_v1, %v190_v12  ;;  %v206_v22 = vadd.f32 %v291_v1, %v191_v13  ;;  %v193_v23 = vmul.f32 %v290_v0, %v178_v15 }
  0x15   : > { %v209_v24 = vmax.f32 %v201_v16, 0.0  ;;  %v210_v25 = vmax.f32 %v202_v17, 0.0  ;;  %v211_v26 = vmax.f32 %v203_v18, 0.0  ;;  %v207_v27 = vadd.f32 %v291_v1, %v192_v19 }
  0x16   : > { %v212_v28 = vmax.f32 %v204_v20, 0.0  ;;  %v213_v29 = vmax.f32 %v205_v21, 0.0  ;;  %v214_v30 = vmax.f32 %v206_v22, 0.0  ;;  %v208_v31 = vadd.f32 %v291_v1, %v193_v23 }
  0x17   : > { %218 = vst.msk [vmem:[%s170_s24] sm:$0xff] %vm217_vm0, %v209_v24  ;;  %219 = vst.msk [vmem:[%s170_s24 + $0x8] sm:$0xff] %vm217_vm0, %v210_v25  ;;  %v215_v32 = vmax.f32 %v207_v27, 0.0 }
  0x18   : > { %220 = vst.msk [vmem:[%s170_s24 + $0x10] sm:$0xff] %vm217_vm0, %v211_v26  ;;  %221 = vst.msk [vmem:[%s170_s24 + $0x18] sm:$0xff] %vm217_vm0, %v212_v28  ;;  %v216_v33 = vmax.f32 %v208_v31, 0.0 }
  0x19   : > { %222 = vst.msk [vmem:[%s170_s24 + $0x20] sm:$0xff] %vm217_vm0, %v213_v29  ;;  %223 = vst.msk [vmem:[%s170_s24 + $0x28] sm:$0xff] %vm217_vm0, %v214_v30 }
  0x1a   : > { %224 = vst.msk [vmem:[%s170_s24 + $0x30] sm:$0xff] %vm217_vm0, %v215_v32  ;;  %225 = vst.msk [vmem:[%s170_s24 + $0x38] sm:$0xff] %vm217_vm0, %v216_v33 }
  0x1b PF: > { %s13_s12 = sadd.s32 1, %s310_s12  }
  0x1c   : > { %p10_p4 = scmp.ge.s32.totalorder %s13_s12, 4  }
  0x1e   :  { %12 = sbr.rel (!%p10_p4) target bundleno = 1 (0x1), region = 62 }

// kernel: down_forward.3
= control target key start
LH: loop header
LB: loop body
LE: loop exit
PB: predicated region body
PF: predicated region fallthrough
CT: control target
= control target key end

     0   :  { %s1045_s12 = smov 0   ;;  %s1401_s0 = inlined_call_operand.vmem [shape: f32[2,8,2,8,8], index: 0, kind: input, shape index: {}]   ;;  %s1402_s1 = inlined_call_operand.vmem [shape: f32[36,8], index: 1, kind: input, shape index: {}]   ;;  %s1403_s2 = inlined_call_operand.vmem [shape: f32[2,8,8,8], index: 2, kind: output, shape index: {0}]   ;;  %s1404_s3 = inlined_call_operand.vmem [shape: f32[2,2,8], index: 3, kind: output, shape index: {1}]  }
   0x1 LB: > { %s909_s13 = sadd.s32 4294967295, %s1013_s12   ;;  %p913_p0 = scmp.ge.s32.totalorder %s1013_s12, 1  ;;  %s1013_s12 = sphi %s1045_s12, %s14_s12  }
   0x2   : > { %p140_p1 = scmp.lt.s32.totalorder %s1013_s12, 3 }
   0x4   : > { %p141_p2 = pnand %p913_p0, %p140_p1 }
   0x5   : > { %p168_p3 = scmp.lt.s32.totalorder (!%p141_p2), %s909_s13, 1  ;;  %s1015_s18 = smov (!%p141_p2), 124   ;;  %v1016_v24 = vmov (!%p141_p2), 0.0   ;;  %vm276_vm0 = vcmask (!%p141_p2), 1040384   ;;  %vm308_vm1 = vcmask (!%p141_p2), 1046528   ;;  %vm356_vm2 = vcmask (!%p141_p2), 1045504  }
   0x6   : > { %144 = sbr.rel (%p141_p2) target bundleno = 613 (0x265), region = 28  ;;  %v1059_v25 = vrot.slane (!%p141_p2), %v1016_v24, 1  ;;  %s1017_s19 = smov (!%p141_p2), 4   ;;  %v1063_v26 = vrot.slane (!%p141_p2), %v1016_v24, 2  ;;  %vm653_vm3 = vcmask (!%p141_p2), 1043456   ;;  %vm556_vm4 = vcmask (!%p141_p2), 31744  }
   0x7   : > { %s1018_s20 = smov (!%p141_p2), 24   ;;  %s1019_s21 = smov (!%p141_p2), 8   ;;  %vm565_vm5 = vcmask (!%p141_p2), 64512   ;;  %vm574_vm6 = vcmask (!%p141_p2), 97280   ;;  %vm583_vm7 = vcmask (!%p141_p2), 130048   ;;  %vm592_vm8 = vcmask (!%p141_p2), 162816  }
   0x8   : > { %s1020_s22 = smov (!%p141_p2), 12   ;;  %s1021_s23 = smov (!%p141_p2), 16   ;;  %vm601_vm9 = vcmask (!%p141_p2), 195584   ;;  %vm610_vm10 = vcmask (!%p141_p2), 228352   ;;  %vm619_vm11 = vcmask (!%p141_p2), 261120   ;;  %vm628_vm12 = vcmask (!%p141_p2), 293888  }
   0x9   : > { %s1022_s28 = smov (!%p141_p2), 20   ;;  %s1023_s8 = smov (!%p141_p2), 28   ;;  %vm821_vm13 = vcmask (!%p141_p2), 58368  }
   0xa   : > { %s1024_s9 = smov (!%p141_p2), 32  }
   0xd   : > { %s1406_s13 = smov (!%p168_p3, %s909_s13), 1 }
   0xe   : > { %s938_s14 = sshll.u32 %s1406_s13, 7  ;;  %s939_s10 = sshll.u32 %s1406_s13, 6 }
   0xf   : > { %s172_s17 = scalar_lea.vmem %s1401_s0, %s938_s14  ;;  %s1359_s15 = scalar_lea.vmem %s1403_s2, %s939_s10 }
  0x10   : > { %v182_v0 = vld [vmem:[%s172_s17] sm:$0xff]  ;;  %v919_v1 = vld [vmem:[%s172_s17 + $0x8] sm:$0xff]  ;;  %v183_v5 = vld [vmem:[%s172_s17 + $0x10] sm:$0xff]  ;;  %s918_s16 = sshll.u32 %s1406_s13, 1 }
  0x11   : > { %v184_v2 = vld [vmem:[%s172_s17 + $0x20] sm:$0xff]  ;;  %v199_v3 = vmax.f32 %v182_v0, %v919_v1  ;;  %v921_v4 = vld [vmem:[%s172_s17 + $0x28] sm:$0xff]  ;;  %v920_v6 = vld [vmem:[%s172_s17 + $0x18] sm:$0xff] }
  0x12   : > { %v201_v7 = vmax.f32 %v184_v2, %v921_v4  ;;  %v185_v8 = vld [vmem:[%s172_s17 + $0x30] sm:$0xff]  ;;  %v922_v9 = vld [vmem:[%s172_s17 + $0x38] sm:$0xff]  ;;  %v200_v10 = vmax.f32 %v183_v5, %v920_v6  ;;  %v186_v12 = vld [vmem:[%s172_s17 + $0x40] sm:$0xff] }
  0x13   : > { %215 = vrot.lane.b32.xlu0 %v199_v3, %s1015_s18  ;;  %v202_v11 = vmax.f32 %v185_v8, %v922_v9  ;;  %v923_v13 = vld [vmem:[%s172_s17 + $0x48] sm:$0xff]  ;;  %v187_v14 = vld [vmem:[%s172_s17 + $0x50] sm:$0xff]  ;;  %v924_v15 = vld [vmem:[%s172_s17 + $0x58] sm:$0xff] }
  0x14   : > { %219 = vrot.lane.b32.xlu1 %v201_v7, %s1015_s18  ;;  %v203_v16 = vmax.f32 %v186_v12, %v923_v13  ;;  %v204_v17 = vmax.f32 %v187_v14, %v924_v15  ;;  %v188_v18 = vld [vmem:[%s172_s17 + $0x60] sm:$0xff]  ;;  %v925_v19 = vld [vmem:[%s172_s17 + $0x68] sm:$0xff]  ;;  %v189_v20 = vld [vmem:[%s172_s17 + $0x70] sm:$0xff] }
  0x15   : > { %v926_v21 = vld [vmem:[%s172_s17 + $0x78] sm:$0xff]  ;;  %v205_v22 = vmax.f32 %v188_v18, %v925_v19 }
  0x16   : > { %v206_v23 = vmax.f32 %v189_v20, %v926_v21 }
  0x17   : > { %217 = vrot.lane.b32.xlu0 %v200_v10, %s1015_s18 }
  0x18   : > { %221 = vrot.lane.b32.xlu1 %v202_v11, %s1015_s18 }
  0x1b   : > { %223 = vrot.lane.b32.xlu0 %v203_v16, %s1015_s18 }
  0x1c   : > { %225 = vrot.lane.b32.xlu1 %v204_v17, %s1015_s18 }
  0x1f   : > { %227 = vrot.lane.b32.xlu0 %v205_v22, %s1015_s18 }
  0x20   : > { %229 = vrot.lane.b32.xlu1 %v206_v23, %s1015_s18 }
  0x23   : > { %332 = vrot.lane.b32.xlu0 %v1059_v25, %s1017_s19 }
  0x24   : > { %498 = vrot.lane.b32.xlu1 %v1016_v24, %s1018_s20 }
  0x27   : > { %380 = vrot.lane.b32.xlu0 %v1063_v26, %s1019_s21 }
  0x85   : > { %v216_v27 = vpop.permute.xlu0 %215 }
  0x86   : > { %v239_v28 = vmax.f32 %v199_v3, %v216_v27  ;;  %v220_v29 = vpop.permute.xlu1 %219 }
  0x87   : > { %v241_v30 = vmax.f32 %v201_v7, %v220_v29  ;;  %v249_v29 = vld [vmem:[%s1402_s1 + $0x10] sm:$0xff] }
  0x88   : > { %v260_v31 = vrot.slane %v239_v28, 7 }
  0x89   : > { %v262_v32 = vrot.slane %v241_v30, 7  ;;  %v218_v33 = vpop.permute.xlu0 %217  ;;  %v250_v30 = vld [vmem:[%s1402_s1 + $0x18] sm:$0xff] }
  0x8a   : > { %v1069_v34 = vsel %vm276_vm0, 0.0, %v260_v31  ;;  %v240_v35 = vmax.f32 %v200_v10, %v218_v33  ;;  %v222_v36 = vpop.permute.xlu1 %221  ;;  %v285_v2 = vsel %vm276_vm0, %v260_v31, 0.0  ;;  %v979_v31 = vpack.c.bf16 %v250_v30, %v249_v29 }
  0x8b   : > { %405 = vrot.lane.b32.xlu0 %v1069_v34, %s1020_s22  ;;  %v1074_v37 = vsel %vm276_vm0, 0.0, %v262_v32  ;;  %v242_v39 = vmax.f32 %v202_v11, %v222_v36  ;;  %v312_v3 = vrot.slane %v285_v2, 1  ;;  %v311_v4 = vrot.slane %v1069_v34, 1 }
  0x8c   : > { %v261_v38 = vrot.slane %v240_v35, 7  ;;  %v360_v6 = vrot.slane %v285_v2, 2  ;;  %v359_v10 = vrot.slane %v1069_v34, 2  ;;  %v287_v11 = vsel %vm276_vm0, %v262_v32, 0.0  ;;  %v251_v35 = vld [vmem:[%s1402_s1 + $0x20] sm:$0xf] }
  0x8d   : > { %v224_v40 = vpop.permute.xlu0 %223  ;;  %v1079_v42 = vrot.slane %v242_v39, 7  ;;  %v313_v8 = vsel %vm308_vm1, %v311_v4, %v312_v3  ;;  %v318_v12 = vrot.slane %v287_v11, 1  ;;  %v317_v15 = vrot.slane %v1074_v37, 1 }
  0x8e   : > { %v1077_v41 = vsel %vm276_vm0, 0.0, %v261_v38  ;;  %v243_v43 = vmax.f32 %v203_v16, %v224_v40  ;;  %v226_v44 = vpop.permute.xlu1 %225  ;;  %v286_v5 = vsel %vm276_vm0, %v261_v38, 0.0  ;;  %v361_v14 = vsel %vm356_vm2, %v359_v10, %v360_v6 }
  0x8f   : > { %486 = vrot.lane.b32.xlu0 %v1074_v37, %s1018_s20  ;;  %407 = vrot.lane.b32.xlu1 %v1077_v41, %s1020_s22  ;;  %v1087_v45 = vsel %vm276_vm0, 0.0, %v1079_v42  ;;  %v244_v47 = vmax.f32 %v204_v17, %v226_v44  ;;  %v315_v7 = vrot.slane %v286_v5, 1  ;;  %v314_v9 = vrot.slane %v1077_v41, 1 }
  0x90   : > { %v1089_v46 = vrot.slane %v243_v43, 7  ;;  %v363_v16 = vrot.slane %v286_v5, 2  ;;  %v319_v17 = vsel %vm308_vm1, %v317_v15, %v318_v12  ;;  %v362_v18 = vrot.slane %v1077_v41, 2 }
  0x91   : > { %v228_v48 = vpop.permute.xlu0 %227  ;;  %v1099_v51 = vrot.slane %v244_v47, 7  ;;  %v316_v13 = vsel %vm308_vm1, %v314_v9, %v315_v7  ;;  %v366_v19 = vrot.slane %v287_v11, 2  ;;  %v365_v21 = vrot.slane %v1074_v37, 2 }
  0x92   : > { %v230_v49 = vpop.permute.xlu1 %229  ;;  %v1097_v50 = vsel %vm276_vm0, 0.0, %v1089_v46  ;;  %v245_v52 = vmax.f32 %v205_v22, %v228_v48  ;;  %v364_v20 = vsel %vm356_vm2, %v362_v18, %v363_v16  ;;  %v247_v22 = vld [vmem:[%s1402_s1] sm:$0xff]  ;;  %v288_v28 = vsel %vm276_vm0, %v1079_v42, 0.0 }
  0x93   : > { %411 = vrot.lane.b32.xlu0 %v1087_v45, %s1020_s22  ;;  %484 = vrot.lane.b32.xlu1 %v1077_v41, %s1018_s20  ;;  %v246_v53 = vmax.f32 %v206_v23, %v230_v49  ;;  %v1107_v55 = vsel %vm276_vm0, 0.0, %v1099_v51  ;;  %v248_v23 = vld [vmem:[%s1402_s1 + $0x8] sm:$0xff]  ;;  %v367_v27 = vsel %vm356_vm2, %v365_v21, %v366_v19  ;;  %v321_v32 = vrot.slane %v288_v28, 1 }
  0x94   : > { %v1109_v56 = vrot.slane %v245_v52, 7  ;;  %v975_v24 = vpack.c.bf16 %v248_v23, %v247_v22  ;;  %v320_v33 = vrot.slane %v1087_v45, 1  ;;  %v289_v38 = vsel %vm276_vm0, %v1089_v46, 0.0 }
  0x95   : > { %v267_v54 = vrot.slane %v246_v53, 7  ;;  %v324_v39 = vrot.slane %v289_v38, 1  ;;  %v323_v40 = vrot.slane %v1097_v50, 1  ;;  %v369_v42 = vrot.slane %v288_v28, 2  ;;  %v333_v5 = vpop.permute.xlu0 %332 }
  0x96   : > { %v1119_v62 = vsel %vm276_vm0, 0.0, %v1109_v56  ;;  %976 = vmatprep.subr.bf16.mxu0 %v975_v24  ;;  %983 = vmatprep.subr.bf16.mxu1 %v975_v24  ;;  %v322_v36 = vsel %vm308_vm1, %v320_v33, %v321_v32  ;;  %v368_v44 = vrot.slane %v1087_v45, 2  ;;  %v372_v46 = vrot.slane %v289_v38, 2  ;;  %v1235_v7 = vpop.permute.xlu1 %498 }
  0x97   : > { %409 = vrot.lane.b32.xlu1 %v1074_v37, %s1020_s22  ;;  %490 = vrot.lane.b32.xlu0 %v1097_v50, %s1018_s20  ;;  %v292_v57 = vsel %vm276_vm0, %v267_v54, 0.0  ;;  %v284_v59 = vsel %vm276_vm0, 0.0, %v267_v54  ;;  %v325_v43 = vsel %vm308_vm1, %v323_v40, %v324_v39  ;;  %v371_v48 = vrot.slane %v1097_v50, 2 }
  0x98   : > { %v431_v58 = vrot.slane %v292_v57, 1  ;;  %v458_v60 = vrot.slane %v292_v57, 2  ;;  %v430_v61 = vrot.slane %v284_v59, 1  ;;  %v457_v0 = vrot.slane %v284_v59, 2  ;;  %978 = vmatpush3.bf16.msra.mxu0 %v975_v24  ;;  %986 = vmatpush3.bf16.msra.mxu1 %v975_v24 }
  0x99   : > { %980 = vmatprep.subr.bf16.mxu0 %v979_v31  ;;  %984 = vmatprep.subr.bf16.mxu1 %v979_v31  ;;  %v370_v47 = vsel %vm356_vm2, %v368_v44, %v369_v42  ;;  %v373_v49 = vsel %vm356_vm2, %v371_v48, %v372_v46  ;;  %v290_v52 = vsel %vm276_vm0, %v1099_v51, 0.0  ;;  %v326_v54 = vrot.slane %v1107_v55, 1  ;;  %v381_v6 = vpop.permute.xlu0 %380 }
  0x9a   : > { %v1122_v63 = vsel %vm308_vm1, %v430_v61, %v431_v58  ;;  %v1129_v1 = vsel %vm356_vm2, %v457_v0, %v458_v60  ;;  %v327_v53 = vrot.slane %v290_v52, 1  ;;  %v291_v58 = vsel %vm276_vm0, %v1109_v56, 0.0 }
  0x9b   : > { %488 = vrot.lane.b32.xlu1 %v1087_v45, %s1018_s20  ;;  %415 = vrot.lane.b32.xlu0 %v1107_v55, %s1020_s22  ;;  %v330_v51 = vrot.slane %v291_v58, 1  ;;  %v375_v60 = vrot.slane %v290_v52, 2  ;;  %v374_v0 = vrot.slane %v1107_v55, 2  ;;  %v378_v56 = vrot.slane %v291_v58, 2 }
  0x9c   : > { %982 = vmatpush3.bf16.msra.mxu0 %v979_v31  ;;  %987 = vmatpush3.bf16.msra.mxu1 %v979_v31  ;;  %v328_v57 = vsel %vm308_vm1, %v326_v54, %v327_v53  ;;  %v377_v3 = vrot.slane %v1119_v62, 2  ;;  %v557_v29 = vsel %vm556_vm4, 0.0, %v333_v5 }
  0x9d   : > { %961 = vmatprep.subr.msk.mxu0 %vm653_vm3, %v251_v35  ;;  %985 = vmatprep.subr.msk.mxu1 %vm653_vm3, %v251_v35  ;;  %v376_v2 = vsel %vm356_vm2, %v374_v0, %v375_v60  ;;  %v566_v32 = vsel %vm565_vm5, %v557_v29, %v381_v6 }
  0x9e   : > { %v379_v4 = vsel %vm356_vm2, %v377_v3, %v378_v56 }
  0x9f   : > { %413 = vrot.lane.b32.xlu1 %v1097_v50, %s1020_s22  ;;  %494 = vrot.lane.b32.xlu0 %v1119_v62, %s1018_s20 }
  0xa0   : > { %962 = vmatpush3.msk.msra.mxu0 %vm653_vm3, %v251_v35  ;;  %988 = vmatpush3.msk.msra.mxu1 %vm653_vm3, %v251_v35 }
  0xa3   : > { %492 = vrot.lane.b32.xlu1 %v1107_v55, %s1018_s20  ;;  %419 = vrot.lane.b32.xlu0 %v284_v59, %s1020_s22 }
  0xa7   : > { %496 = vrot.lane.b32.xlu0 %v284_v59, %s1018_s20  ;;  %417 = vrot.lane.b32.xlu1 %v1119_v62, %s1020_s22  ;;  %v329_v59 = vrot.slane %v1119_v62, 1 }
  0xa9   : > { %v331_v61 = vsel %vm308_vm1, %v329_v59, %v330_v51 }
  0xab   : > { %433 = vrot.lane.b32.xlu0 %v313_v8, %s1021_s23  ;;  %334 = vrot.lane.b32.xlu1 %v313_v8, %s1017_s19 }
  0xaf   : > { %435 = vrot.lane.b32.xlu0 %v316_v13, %s1021_s23  ;;  %382 = vrot.lane.b32.xlu1 %v361_v14, %s1019_s21 }
  0xb3   : > { %338 = vrot.lane.b32.xlu0 %v319_v17, %s1017_s19  ;;  %336 = vrot.lane.b32.xlu1 %v316_v13, %s1017_s19 }
  0xb7   : > { %462 = vrot.lane.b32.xlu0 %v364_v20, %s1022_s28  ;;  %460 = vrot.lane.b32.xlu1 %v361_v14, %s1022_s28 }
  0xbb   : > { %386 = vrot.lane.b32.xlu0 %v367_v27, %s1019_s21  ;;  %384 = vrot.lane.b32.xlu1 %v364_v20, %s1019_s21 }
  0xbf   : > { %510 = vrot.lane.b32.xlu0 %v319_v17, %s1023_s8  ;;  %508 = vrot.lane.b32.xlu1 %v316_v13, %s1023_s8 }
  0xc3   : > { %340 = vrot.lane.b32.xlu0 %v322_v36, %s1017_s19  ;;  %437 = vrot.lane.b32.xlu1 %v319_v17, %s1021_s23 }
  0xc7   : > { %464 = vrot.lane.b32.xlu0 %v367_v27, %s1022_s28  ;;  %532 = vrot.lane.b32.xlu1 %v364_v20, %s1024_s9 }
  0xcb   : > { %342 = vrot.lane.b32.xlu0 %v325_v43, %s1017_s19  ;;  %439 = vrot.lane.b32.xlu1 %v322_v36, %s1021_s23 }
  0xcf   : > { %466 = vrot.lane.b32.xlu0 %v370_v47, %s1022_s28  ;;  %534 = vrot.lane.b32.xlu1 %v367_v27, %s1024_s9 }
  0xd3   : > { %390 = vrot.lane.b32.xlu0 %v373_v49, %s1019_s21  ;;  %388 = vrot.lane.b32.xlu1 %v370_v47, %s1019_s21 }
  0xd7   : > { %514 = vrot.lane.b32.xlu0 %v325_v43, %s1023_s8  ;;  %512 = vrot.lane.b32.xlu1 %v322_v36, %s1023_s8 }
  0xdb   : > { %344 = vrot.lane.b32.xlu0 %v328_v57, %s1017_s19  ;;  %441 = vrot.lane.b32.xlu1 %v325_v43, %s1021_s23 }
  0xdf   : > { %468 = vrot.lane.b32.xlu0 %v373_v49, %s1022_s28  ;;  %536 = vrot.lane.b32.xlu1 %v370_v47, %s1024_s9 }
  0xe3   : > { %443 = vrot.lane.b32.xlu1 %v328_v57, %s1021_s23  ;;  %346 = vrot.lane.b32.xlu0 %v331_v61, %s1017_s19  ;;  %s181_s19 = scalar_lea.vmem %s1404_s3, %s918_s16 }
  0xe7   : > { %538 = vrot.lane.b32.xlu1 %v373_v49, %s1024_s9  ;;  %470 = vrot.lane.b32.xlu0 %v376_v2, %s1022_s28 }
  0xeb   : > { %392 = vrot.lane.b32.xlu1 %v376_v2, %s1019_s21  ;;  %394 = vrot.lane.b32.xlu0 %v379_v4, %s1019_s21 }
  0xef   : > { %516 = vrot.lane.b32.xlu1 %v328_v57, %s1023_s8  ;;  %518 = vrot.lane.b32.xlu0 %v331_v61, %s1023_s8 }
  0xf3   : > { %445 = vrot.lane.b32.xlu1 %v331_v61, %s1021_s23  ;;  %447 = vrot.lane.b32.xlu0 %v1122_v63, %s1021_s23 }
  0xf7   : > { %540 = vrot.lane.b32.xlu1 %v376_v2, %s1024_s9  ;;  %542 = vrot.lane.b32.xlu0 %v379_v4, %s1024_s9 }
  0xfb   : > { %472 = vrot.lane.b32.xlu1 %v379_v4, %s1022_s28  ;;  %520 = vrot.lane.b32.xlu0 %v1122_v63, %s1023_s8 }
  0xfd   : > { %v406_v8 = vpop.permute.xlu0 %405 }
  0xfe   : > { %v575_v36 = vsel %vm574_vm6, %v566_v32, %v406_v8 }
  0xff   : > { %474 = vrot.lane.b32.xlu1 %v1129_v1, %s1022_s28  ;;  %544 = vrot.lane.b32.xlu0 %v1129_v1, %s1024_s9 }
 0x101   : > { %v408_v9 = vpop.permute.xlu1 %407  ;;  %v1241_v10 = vpop.permute.xlu0 %486 }
 0x103   : > { %522 = vrot.lane.b32.xlu1 %v1059_v25, %s1023_s8 }
 0x105   : > { %v485_v11 = vpop.permute.xlu1 %484  ;;  %v1245_v12 = vpop.permute.xlu0 %411 }
 0x107   : > { %546 = vrot.lane.b32.xlu1 %v1063_v26, %s1024_s9 }
 0x109   : > { %v410_v63 = vpop.permute.xlu1 %409  ;;  %v1249_v13 = vpop.permute.xlu0 %490 }
 0x10d   : > { %v489_v14 = vpop.permute.xlu1 %488  ;;  %v1251_v15 = vpop.permute.xlu0 %415 }
 0x111   : > { %v1253_v16 = vpop.permute.xlu1 %413  ;;  %v1255_v1 = vpop.permute.xlu0 %494 }
 0x115   : > { %v1257_v17 = vpop.permute.xlu1 %492  ;;  %v1259_v18 = vpop.permute.xlu0 %419 }
 0x119   : > { %v1261_v25 = vpop.permute.xlu1 %417  ;;  %v1263_v19 = vpop.permute.xlu0 %496 }
 0x11d   : > { %v335_v20 = vpop.permute.xlu1 %334  ;;  %v434_v26 = vpop.permute.xlu0 %433 }
 0x11e   : > { %v584_v38 = vsel %vm583_vm7, %v575_v36, %v434_v26  ;;  %v558_v40 = vsel %vm556_vm4, %v1069_v34, %v335_v20 }
 0x121   : > { %v383_v21 = vpop.permute.xlu1 %382  ;;  %v436_v22 = vpop.permute.xlu0 %435 }
 0x122   : > { %v567_v47 = vsel %vm565_vm5, %v558_v40, %v383_v21 }
 0x125   : > { %v337_v23 = vpop.permute.xlu1 %336  ;;  %v339_v24 = vpop.permute.xlu0 %338 }
 0x126   : > { %v559_v39 = vsel %vm556_vm4, %v1077_v41, %v337_v23  ;;  %v576_v41 = vsel %vm574_vm6, %v567_v47, %v408_v9  ;;  %v560_v60 = vsel %vm556_vm4, %v1074_v37, %v339_v24 }
 0x127   : > { %v585_v59 = vsel %vm583_vm7, %v576_v41, %v436_v22 }
 0x129   : > { %v461_v27 = vpop.permute.xlu1 %460  ;;  %v463_v28 = vpop.permute.xlu0 %462 }
 0x12a   : > { %v593_v42 = vsel %vm592_vm8, %v584_v38, %v461_v27  ;;  %v594_v61 = vsel %vm592_vm8, %v585_v59, %v463_v28 }
 0x12b   : > { %v602_v48 = vsel %vm601_vm9, %v593_v42, %v485_v11  ;;  %v603_v3 = vsel %vm601_vm9, %v594_v61, %v1241_v10 }
 0x12d   : > { %v385_v30 = vpop.permute.xlu1 %384  ;;  %v387_v31 = vpop.permute.xlu0 %386 }
 0x12e   : > { %v568_v43 = vsel %vm565_vm5, %v559_v39, %v385_v30  ;;  %v569_v0 = vsel %vm565_vm5, %v560_v60, %v387_v31 }
 0x12f   : > { %v577_v49 = vsel %vm574_vm6, %v568_v43, %v410_v63  ;;  %v578_v4 = vsel %vm574_vm6, %v569_v0, %v1245_v12 }
 0x131   : > { %v509_v33 = vpop.permute.xlu1 %508  ;;  %v511_v35 = vpop.permute.xlu0 %510 }
 0x132   : > { %v611_v34 = vsel %vm610_vm10, %v602_v48, %v509_v33  ;;  %v612_v5 = vsel %vm610_vm10, %v603_v3, %v511_v35 }
 0x135   : > { %v438_v44 = vpop.permute.xlu1 %437  ;;  %v341_v46 = vpop.permute.xlu0 %340 }
 0x136   : > { %v586_v52 = vsel %vm583_vm7, %v577_v49, %v438_v44  ;;  %v561_v12 = vsel %vm556_vm4, %v1087_v45, %v341_v46 }
 0x139   : > { %v533_v53 = vpop.permute.xlu1 %532  ;;  %v465_v54 = vpop.permute.xlu0 %464 }
 0x13a   : > { %v595_v57 = vsel %vm592_vm8, %v586_v52, %v465_v54  ;;  %v620_v58 = vsel %vm619_vm11, %v611_v34, %v533_v53 }
 0x13b   : > { %963 = vmatprep.mubr.msk.f32.mxu0 %vm628_vm12, %v620_v58  ;;  %v604_v51 = vsel %vm601_vm9, %v595_v57, %v489_v14 }
 0x13d   : > { %v440_v56 = vpop.permute.xlu1 %439  ;;  %v343_v2 = vpop.permute.xlu0 %342 }
 0x13e   : > { %v587_v6 = vsel %vm583_vm7, %v578_v4, %v440_v56 }
 0x141   : > { %v535_v8 = vpop.permute.xlu1 %534  ;;  %v467_v9 = vpop.permute.xlu0 %466 }
 0x142   : > { %v621_v37 = vsel %vm619_vm11, %v612_v5, %v535_v8  ;;  %v596_v11 = vsel %vm592_vm8, %v587_v6, %v467_v9 }
 0x143   : > { %964 = vmatmul.mubr.msk.f32.vlgmr.msra.gmra.mrb[0].mxu0 %vm628_vm12, %v621_v37  ;;  %v605_v63 = vsel %vm601_vm9, %v596_v11, %v1249_v13 }
 0x145   : > { %v389_v14 = vpop.permute.xlu1 %388  ;;  %v391_v10 = vpop.permute.xlu0 %390 }
 0x146   : > { %v570_v21 = vsel %vm565_vm5, %v561_v12, %v389_v14 }
 0x147   : > { %v579_v24 = vsel %vm574_vm6, %v570_v21, %v1253_v16 }
 0x149   : > { %v513_v20 = vpop.permute.xlu1 %512  ;;  %v515_v26 = vpop.permute.xlu0 %514 }
 0x14a   : > { %v613_v27 = vsel %vm610_vm10, %v604_v51, %v513_v20  ;;  %v614_v35 = vsel %vm610_vm10, %v605_v63, %v515_v26 }
 0x14d   : > { %v442_v22 = vpop.permute.xlu1 %441  ;;  %v345_v23 = vpop.permute.xlu0 %344 }
 0x14e   : > { %v588_v28 = vsel %vm583_vm7, %v579_v24, %v442_v22 }
 0x151   : > { %v537_v29 = vpop.permute.xlu1 %536  ;;  %v469_v13 = vpop.permute.xlu0 %468 }
 0x152   : > { %v622_v30 = vsel %vm619_vm11, %v613_v27, %v537_v29  ;;  %v597_v31 = vsel %vm592_vm8, %v588_v28, %v469_v13 }
 0x153   : > { %966 = vmatprep.mubr.msk.f32.mxu0 %vm628_vm12, %v622_v30  ;;  %v606_v45 = vsel %vm601_vm9, %v597_v31, %v1257_v17  ;;  %v562_v17 = vsel %vm556_vm4, %v1097_v50, %v343_v2  ;;  %v563_v50 = vsel %vm556_vm4, %v1107_v55, %v345_v23 }
 0x154   : > { %v571_v46 = vsel %vm565_vm5, %v562_v17, %v391_v10 }
 0x155   : > { %v444_v32 = vpop.permute.xlu1 %443  ;;  %v347_v33 = vpop.permute.xlu0 %346  ;;  %v580_v49 = vsel %vm574_vm6, %v571_v46, %v1251_v15 }
 0x156   : > { %v564_v39 = vsel %vm556_vm4, %v1119_v62, %v347_v33  ;;  %v589_v41 = vsel %vm583_vm7, %v580_v49, %v444_v32 }
 0x159   : > { %v539_v16 = vpop.permute.xlu1 %538  ;;  %v471_v36 = vpop.permute.xlu0 %470 }
 0x15a   : > { %v623_v38 = vsel %vm619_vm11, %v614_v35, %v539_v16  ;;  %v598_v62 = vsel %vm592_vm8, %v589_v41, %v471_v36 }
 0x15b   : > { %967 = vmatmul.mubr.msk.f32.gmra.mrb[2].mxu0 %vm628_vm12, %v623_v38 }
 0x15d   : > { %v393_v40 = vpop.permute.xlu1 %392  ;;  %v395_v42 = vpop.permute.xlu0 %394 }
 0x15e   : > { %v573_v43 = vsel %vm565_vm5, %v564_v39, %v395_v42  ;;  %v572_v54 = vsel %vm565_vm5, %v563_v50, %v393_v40 }
 0x15f   : > { %v582_v44 = vsel %vm574_vm6, %v573_v43, %v1259_v18  ;;  %v607_v18 = vsel %vm601_vm9, %v598_v62, %v1255_v1  ;;  %v581_v55 = vsel %vm574_vm6, %v572_v54, %v1261_v25 }
 0x161   : > { %v517_v47 = vpop.permute.xlu1 %516  ;;  %v519_v48 = vpop.permute.xlu0 %518 }
 0x162   : > { %v615_v57 = vsel %vm610_vm10, %v606_v45, %v517_v47  ;;  %v616_v15 = vsel %vm610_vm10, %v607_v18, %v519_v48 }
 0x165   : > { %v446_v34 = vpop.permute.xlu1 %445  ;;  %v448_v52 = vpop.permute.xlu0 %447 }
 0x166   : > { %v591_v53 = vsel %vm583_vm7, %v582_v44, %v448_v52  ;;  %v590_v1 = vsel %vm583_vm7, %v581_v55, %v446_v34 }
 0x169   : > { %v541_v58 = vpop.permute.xlu1 %540  ;;  %v543_v51 = vpop.permute.xlu0 %542 }
 0x16a   : > { %v625_v59 = vsel %vm619_vm11, %v616_v15, %v543_v51  ;;  %v624_v60 = vsel %vm619_vm11, %v615_v57, %v541_v58 }
 0x16b   : > { %969 = vmatprep.mubr.msk.f32.mxu1 %vm628_vm12, %v624_v60 }
 0x16c   : > { %970 = vmatmul.mubr.msk.f32.vlgmr.msra.gmra.mrb[0].mxu1 %vm628_vm12, %v625_v59 }
 0x16d   : > { %v473_v61 = vpop.permute.xlu1 %472  ;;  %v521_v0 = vpop.permute.xlu0 %520 }
 0x16e   : > { %v599_v56 = vsel %vm592_vm8, %v590_v1, %v473_v61 }
 0x16f   : > { %v608_v2 = vsel %vm601_vm9, %v599_v56, %v1263_v19 }
 0x170   : > { %v617_v3 = vsel %vm610_vm10, %v608_v2, %v521_v0 }
 0x171   : > { %v475_v4 = vpop.permute.xlu1 %474  ;;  %v545_v5 = vpop.permute.xlu0 %544 }
 0x172   : > { %v600_v6 = vsel %vm592_vm8, %v591_v53, %v475_v4  ;;  %v626_v25 = vsel %vm619_vm11, %v617_v3, %v545_v5 }
 0x173   : > { %972 = vmatprep.mubr.msk.f32.mxu1 %vm628_vm12, %v626_v25  ;;  %v609_v8 = vsel %vm601_vm9, %v600_v6, %v1235_v7 }
 0x175   : > { %v523_v9 = vpop.permute.xlu1 %522 }
 0x176   : > { %v618_v37 = vsel %vm610_vm10, %v609_v8, %v523_v9 }
 0x179   : > { %v547_v11 = vpop.permute.xlu1 %546 }
 0x17a   : > { %v627_v63 = vsel %vm619_vm11, %v618_v37, %v547_v11 }
 0x17b   : > { %973 = vmatmul.mubr.msk.f32.gmra.mrb[2].mxu1 %vm628_vm12, %v627_v63 }
 0x216   : > { %v965_v19 = vpop.f32.mrb[0].mxu0 }
 0x217   : > { %763 = vst.msk [vmem:[%s1359_s15 + $0x8] sm:$0xff] %vm565_vm5, %v965_v19  ;;  %v771_v7 = vsel %vm565_vm5, %v965_v19, 0.0  ;;  %v792_v14 = vmul.f32 %v965_v19, %v965_v19  ;;  %v723_v10 = vpop.f32.mrb[1].mxu0 }
 0x218   : > { %762 = vst.msk [vmem:[%s1359_s15] sm:$0xff] %vm565_vm5, %v723_v10  ;;  %v770_v20 = vsel %vm565_vm5, %v723_v10, 0.0  ;;  %v791_v26 = vmul.f32 %v723_v10, %v723_v10 }
 0x219   : > { %v800_v12 = vsel %vm565_vm5, %v792_v14, 0.0  ;;  %v772_v21 = vadd.f32 %v771_v7, %v770_v20 }
 0x21a   : > { %v799_v22 = vsel %vm565_vm5, %v791_v26, 0.0 }
 0x21b   : > { %v801_v23 = vadd.f32 %v800_v12, %v799_v22 }
 0x22e   : > { %v968_v24 = vpop.f32.mrb[2].mxu0 }
 0x22f   : > { %765 = vst.msk [vmem:[%s1359_s15 + $0x18] sm:$0xff] %vm565_vm5, %v968_v24  ;;  %v733_v27 = vpop.f32.mrb[3].mxu0  ;;  %v794_v28 = vmul.f32 %v968_v24, %v968_v24  ;;  %v775_v31 = vsel %vm565_vm5, %v968_v24, 0.0 }
 0x230   : > { %764 = vst.msk [vmem:[%s1359_s15 + $0x10] sm:$0xff] %vm565_vm5, %v733_v27  ;;  %v773_v29 = vsel %vm565_vm5, %v733_v27, 0.0  ;;  %v793_v13 = vmul.f32 %v733_v27, %v733_v27 }
 0x231   : > { %v774_v30 = vadd.f32 %v773_v29, %v772_v21  ;;  %v804_v35 = vsel %vm565_vm5, %v794_v28, 0.0 }
 0x232   : > { %v802_v45 = vsel %vm565_vm5, %v793_v13, 0.0 }
 0x233   : > { %v776_v32 = vadd.f32 %v775_v31, %v774_v30  ;;  %v803_v33 = vadd.f32 %v802_v45, %v801_v23 }
 0x235   : > { %v805_v16 = vadd.f32 %v804_v35, %v803_v33 }
 0x23f   : > { %v971_v36 = vpop.f32.mrb[0].mxu1 }
 0x240   : > { %767 = vst.msk [vmem:[%s1359_s15 + $0x28] sm:$0xff] %vm565_vm5, %v971_v36  ;;  %v743_v38 = vpop.f32.mrb[1].mxu1  ;;  %v796_v39 = vmul.f32 %v971_v36, %v971_v36  ;;  %v779_v17 = vsel %vm565_vm5, %v971_v36, 0.0 }
 0x241   : > { %766 = vst.msk [vmem:[%s1359_s15 + $0x20] sm:$0xff] %vm565_vm5, %v743_v38  ;;  %v777_v40 = vsel %vm565_vm5, %v743_v38, 0.0  ;;  %v795_v42 = vmul.f32 %v743_v38, %v743_v38 }
 0x242   : > { %v778_v43 = vadd.f32 %v777_v40, %v776_v32  ;;  %v808_v48 = vsel %vm565_vm5, %v796_v39, 0.0 }
 0x243   : > { %v806_v44 = vsel %vm565_vm5, %v795_v42, 0.0 }
 0x244   : > { %v807_v46 = vadd.f32 %v806_v44, %v805_v16  ;;  %v780_v47 = vadd.f32 %v779_v17, %v778_v43 }
 0x246   : > { %v809_v49 = vadd.f32 %v808_v48, %v807_v46 }
 0x24e   : > { %v974_v41 = vpop.f32.mrb[2].mxu1 }
 0x24f   : > { %769 = vst.msk [vmem:[%s1359_s15 + $0x38] sm:$0xff] %vm565_vm5, %v974_v41  ;;  %v753_v62 = vpop.f32.mrb[3].mxu1  ;;  %v798_v34 = vmul.f32 %v974_v41, %v974_v41  ;;  %v783_v18 = vsel %vm565_vm5, %v974_v41, 0.0 }
 0x250   : > { %768 = vst.msk [vmem:[%s1359_s15 + $0x30] sm:$0xff] %vm565_vm5, %v753_v62  ;;  %v781_v52 = vsel %vm565_vm5, %v753_v62, 0.0  ;;  %v797_v53 = vmul.f32 %v753_v62, %v753_v62 }
 0x251   : > { %v782_v50 = vadd.f32 %v781_v52, %v780_v47  ;;  %v812_v58 = vsel %vm565_vm5, %v798_v34, 0.0 }
 0x252   : > { %v810_v54 = vsel %vm565_vm5, %v797_v53, 0.0 }
 0x253   : > { %v784_v57 = vadd.f32 %v783_v18, %v782_v50  ;;  %v811_v15 = vadd.f32 %v810_v54, %v809_v49 }
 0x255   : > { %v785_v51 = vrot.slane %v784_v57, 4  ;;  %v813_v59 = vadd.f32 %v812_v58, %v811_v15 }
 0x257   : > { %v786_v60 = vadd.f32 %v785_v51, %v784_v57  ;;  %v814_v55 = vrot.slane %v813_v59, 4 }
 0x259   : > { %v787_v1 = vrot.slane %v786_v60, 2  ;;  %v815_v61 = vadd.f32 %v814_v55, %v813_v59 }
 0x25b   : > { %v788_v0 = vadd.f32 %v787_v1, %v786_v60  ;;  %v816_v56 = vrot.slane %v815_v61, 2 }
 0x25d   : > { %v789_v2 = vrot.slane %v788_v0, 1  ;;  %v817_v3 = vadd.f32 %v816_v56, %v815_v61 }
 0x25f   : > { %v818_v4 = vrot.slane %v817_v3, 1  ;;  %v790_v5 = vadd.f32 %v789_v2, %v788_v0 }
 0x261   : > { %v819_v6 = vadd.f32 %v818_v4, %v817_v3 }
 0x263   : > { %v820_v25 = vsel %vm276_vm0, %v790_v5, %v819_v6 }
 0x264   : > { %822 = vst.msk [vmem:[%s181_s19] sm:$0x3] %vm821_vm13, %v820_v25 }
 0x265 PF: > { %s14_s12 = sadd.s32 1, %s1013_s12  }
 0x266   : > { %p11_p4 = scmp.ge.s32.totalorder %s14_s12, 4  }
 0x268   :  { %13 = sbr.rel (!%p11_p4) target bundleno = 1 (0x1), region = 71 }

// kernel: down_forward.4
= control target key start
LH: loop header
LB: loop body
LE: loop exit
PB: predicated region body
PF: predicated region fallthrough
CT: control target
= control target key end

     0   :  { %s1105_s18 = smov 0   ;;  %s1514_s0 = inlined_call_operand.vmem [shape: f32[2,8,8,8], index: 0, kind: input, shape index: {}]   ;;  %s1515_s1 = inlined_call_operand.vmem [shape: f32[1,8], index: 1, kind: input, shape index: {}]   ;;  %s1516_s2 = inlined_call_operand.vmem [shape: f32[1,8], index: 2, kind: input, shape index: {}]   ;;  %s1517_s3 = inlined_call_operand.vmem [shape: f32[72,8], index: 3, kind: input, shape index: {}]   ;;  %s1518_s4 = inlined_call_operand.vmem [shape: f32[2,8,8,8], index: 4, kind: output, shape index: {0}]   ;;  %s1519_s5 = inlined_call_operand.vmem [shape: f32[2,2,8], index: 5, kind: output, shape index: {1}]  }
   0x1 LB: > { %s944_s19 = sadd.s32 4294967295, %s1064_s18   ;;  %p948_p0 = scmp.ge.s32.totalorder %s1064_s18, 1  ;;  %s1064_s18 = sphi %s1105_s18, %s16_s18  }
   0x2   : > { %p190_p1 = scmp.lt.s32.totalorder %s1064_s18, 3 }
   0x4   : > { %p191_p2 = pnand %p948_p0, %p190_p1 }
   0x5   : > { %v1066_v0 = vmov (!%p191_p2), 0.0   ;;  %p222_p3 = scmp.lt.s32.totalorder (!%p191_p2), %s944_s19, 1  ;;  %s1067_s20 = smov (!%p191_p2), 16   ;;  %v1129_v3 = vld [vmem:[%s1515_s1] ss:$0 sm:$0xff] (!%p191_p2)  ;;  %vm315_vm0 = vcmask (!%p191_p2), 1040384  }
   0x6   : > { %194 = sbr.rel (%p191_p2) target bundleno = 497 (0x1f1), region = 36  ;;  %v1114_v1 = vrot.slane (!%p191_p2), %v1066_v0, 2  ;;  %v1117_v2 = vrot.slane (!%p191_p2), %v1066_v0, 1  ;;  %s1068_s21 = smov (!%p191_p2), 8   ;;  %v1141_v4 = vld [vmem:[%s1516_s2] ss:$0 sm:$0xff] (!%p191_p2) }
   0x7   : > { %vm395_vm1 = vcmask (!%p191_p2), 1045504   ;;  %vm347_vm2 = vcmask (!%p191_p2), 1046528   ;;  %s1069_s30 = smov (!%p191_p2), 24   ;;  %s1070_s6 = smov (!%p191_p2), 32   ;;  %vm595_vm3 = vcmask (!%p191_p2), 64512   ;;  %vm604_vm4 = vcmask (!%p191_p2), 130048  }
   0x8   : > { %419 = vrot.lane.b32.xlu1 (!%p191_p2), %v1114_v1, %s1067_s20  ;;  %371 = vrot.lane.b32.xlu0 (!%p191_p2), %v1117_v2, %s1068_s21  ;;  %s1071_s11 = smov (!%p191_p2), 40   ;;  %s1072_s25 = smov (!%p191_p2), 48   ;;  %vm613_vm5 = vcmask (!%p191_p2), 195584   ;;  %vm622_vm6 = vcmask (!%p191_p2), 261120   ;;  %vm631_vm7 = vcmask (!%p191_p2), 326656   ;;  %vm640_vm8 = vcmask (!%p191_p2), 392192  }
   0x9   : > { %s1073_s7 = smov (!%p191_p2), 56   ;;  %s1074_s10 = smov (!%p191_p2), 64   ;;  %vm649_vm9 = vcmask (!%p191_p2), 457728   ;;  %vm658_vm10 = vcmask (!%p191_p2), 523264   ;;  %vm667_vm11 = vcmask (!%p191_p2), 588800   ;;  %vm856_vm12 = vcmask (!%p191_p2), 58368  }
   0xd   : > { %s1521_s19 = smov (!%p222_p3, %s944_s19), 1 }
   0xe   : > { %s966_s22 = sshll.u32 %s1521_s19, 6 }
   0xf   : > { %s1136_s27 = scalar_lea.vmem %s1514_s0, %s966_s22 }
  0x10   : > { %v237_v5 = vld [vmem:[%s1136_s27 + $0x8] sm:$0xff]  ;;  %v236_v6 = vld [vmem:[%s1136_s27] sm:$0xff]  ;;  %v238_v7 = vld [vmem:[%s1136_s27 + $0x10] sm:$0xff] }
  0x11   : > { %v252_v8 = vmul.f32 %v1129_v3, %v237_v5  ;;  %v251_v9 = vmul.f32 %v1129_v3, %v236_v6  ;;  %v253_v10 = vmul.f32 %v1129_v3, %v238_v7  ;;  %v241_v11 = vld [vmem:[%s1136_s27 + $0x28] sm:$0xff]  ;;  %v242_v13 = vld [vmem:[%s1136_s27 + $0x30] sm:$0xff]  ;;  %v243_v14 = vld [vmem:[%s1136_s27 + $0x38] sm:$0xff] }
  0x12   : > { %v256_v12 = vmul.f32 %v1129_v3, %v241_v11  ;;  %v257_v18 = vmul.f32 %v1129_v3, %v242_v13  ;;  %v258_v20 = vmul.f32 %v1129_v3, %v243_v14  ;;  %v239_v52 = vld [vmem:[%s1136_s27 + $0x18] sm:$0xff]  ;;  %v282_v6 = vld [vmem:[%s1517_s3] sm:$0xff]  ;;  %v283_v7 = vld [vmem:[%s1517_s3 + $0x8] sm:$0xff] }
  0x13   : > { %v267_v15 = vadd.f32 %v1141_v4, %v252_v8  ;;  %v266_v16 = vadd.f32 %v1141_v4, %v251_v9  ;;  %v268_v17 = vadd.f32 %v1141_v4, %v253_v10  ;;  %v254_v63 = vmul.f32 %v1129_v3, %v239_v52 }
  0x14   : > { %v271_v19 = vadd.f32 %v1141_v4, %v256_v12  ;;  %v272_v24 = vadd.f32 %v1141_v4, %v257_v18  ;;  %v273_v25 = vadd.f32 %v1141_v4, %v258_v20 }
  0x15   : > { %v275_v21 = vmax.f32 %v267_v15, 0.0  ;;  %v274_v22 = vmax.f32 %v266_v16, 0.0  ;;  %v276_v23 = vmax.f32 %v268_v17, 0.0 }
  0x16   : > { %v279_v29 = vmax.f32 %v271_v19, 0.0  ;;  %v280_v46 = vmax.f32 %v272_v24, 0.0  ;;  %v281_v47 = vmax.f32 %v273_v25, 0.0  ;;  %v1015_v19 = vpack.c.bf16 %v283_v7, %v282_v6  ;;  %v284_v24 = vld [vmem:[%s1517_s3 + $0x10] sm:$0xff]  ;;  %v285_v25 = vld [vmem:[%s1517_s3 + $0x18] sm:$0xff] }
  0x17   : > { %v300_v26 = vrot.slane %v275_v21, 7  ;;  %v299_v27 = vrot.slane %v274_v22, 7  ;;  %v301_v28 = vrot.slane %v276_v23, 7 }
  0x18   : > { %v304_v44 = vrot.slane %v279_v29, 7  ;;  %v305_v59 = vrot.slane %v280_v46, 7  ;;  %v306_v60 = vrot.slane %v281_v47, 7  ;;  %1016 = vmatprep.subr.bf16.mxu0 %v1015_v19  ;;  %1031 = vmatprep.subr.bf16.mxu1 %v1015_v19  ;;  %v290_v47 = vld [vmem:[%s1517_s3 + $0x40] sm:$0xff] }
  0x19   : > { %v1162_v30 = vsel %vm315_vm0, 0.0, %v300_v26  ;;  %v1165_v31 = vsel %vm315_vm0, 0.0, %v299_v27  ;;  %v324_v32 = vsel %vm315_vm0, %v299_v27, 0.0  ;;  %v325_v33 = vsel %vm315_vm0, %v300_v26, 0.0  ;;  %1018 = vmatpush3.bf16.msra.mxu0 %v1015_v19  ;;  %1036 = vmatpush3.bf16.msra.mxu1 %v1015_v19 }
  0x1a   : > { %446 = vrot.lane.b32.xlu1 %v1162_v30, %s1069_s30  ;;  %444 = vrot.lane.b32.xlu0 %v1165_v31, %s1069_s30  ;;  %v398_v34 = vrot.slane %v1165_v31, 2  ;;  %v399_v35 = vrot.slane %v324_v32, 2  ;;  %v350_v36 = vrot.slane %v1165_v31, 1  ;;  %v351_v37 = vrot.slane %v324_v32, 1 }
  0x1b   : > { %v353_v38 = vrot.slane %v1162_v30, 1  ;;  %v354_v39 = vrot.slane %v325_v33, 1  ;;  %v1181_v42 = vsel %vm315_vm0, 0.0, %v301_v28  ;;  %v1184_v43 = vsel %vm315_vm0, %v301_v28, 0.0 }
  0x1c   : > { %v400_v40 = vsel %vm395_vm1, %v398_v34, %v399_v35  ;;  %v352_v41 = vsel %vm347_vm2, %v350_v36, %v351_v37  ;;  %v401_v48 = vrot.slane %v1162_v30, 2  ;;  %v402_v49 = vrot.slane %v325_v33, 2  ;;  %v240_v34 = vld [vmem:[%s1136_s27 + $0x20] sm:$0xff]  ;;  %v287_v36 = vld [vmem:[%s1517_s3 + $0x28] sm:$0xff] }
  0x1d   : > { %v1187_v45 = vsel %vm347_vm2, %v353_v38, %v354_v39  ;;  %v356_v50 = vrot.slane %v1181_v42, 1  ;;  %v357_v51 = vrot.slane %v1184_v43, 1  ;;  %v1197_v53 = vsel %vm315_vm0, 0.0, %v304_v44  ;;  %v286_v35 = vld [vmem:[%s1517_s3 + $0x20] sm:$0xff] }
  0x1e   : > { %421 = vrot.lane.b32.xlu1 %v400_v40, %s1067_s20  ;;  %373 = vrot.lane.b32.xlu0 %v352_v41, %s1068_s21  ;;  %v329_v54 = vsel %vm315_vm0, %v304_v44, 0.0  ;;  %v365_v55 = vrot.slane %v1197_v53, 1  ;;  %v413_v57 = vrot.slane %v1197_v53, 2  ;;  %v1203_v61 = vsel %vm395_vm1, %v401_v48, %v402_v49 }
  0x1f   : > { %v366_v56 = vrot.slane %v329_v54, 1  ;;  %v414_v58 = vrot.slane %v329_v54, 2  ;;  %v1206_v62 = vsel %vm347_vm2, %v356_v50, %v357_v51  ;;  %v1225_v9 = vsel %vm315_vm0, 0.0, %v305_v59 }
  0x20   : > { %v330_v10 = vsel %vm315_vm0, %v305_v59, 0.0  ;;  %v1229_v11 = vsel %vm315_vm0, 0.0, %v306_v60  ;;  %v368_v12 = vrot.slane %v1225_v9, 1  ;;  %v416_v14 = vrot.slane %v1225_v9, 2 }
  0x21   : > { %v1210_v5 = vsel %vm347_vm2, %v365_v55, %v366_v56  ;;  %v1222_v8 = vsel %vm395_vm1, %v413_v57, %v414_v58  ;;  %v369_v13 = vrot.slane %v330_v10, 1  ;;  %v417_v15 = vrot.slane %v330_v10, 2 }
  0x22   : > { %375 = vrot.lane.b32.xlu1 %v1187_v45, %s1068_s21  ;;  %472 = vrot.lane.b32.xlu0 %v352_v41, %s1070_s6  ;;  %v331_v16 = vsel %vm315_vm0, %v306_v60, 0.0  ;;  %v469_v17 = vrot.slane %v1229_v11, 1  ;;  %v496_v18 = vrot.slane %v1229_v11, 2  ;;  %v269_v26 = vadd.f32 %v1141_v4, %v254_v63  ;;  %v288_v41 = vld [vmem:[%s1517_s3 + $0x30] sm:$0xff] }
  0x23   : > { %v1237_v20 = vsel %vm347_vm2, %v368_v12, %v369_v13  ;;  %v1240_v21 = vsel %vm395_vm1, %v416_v14, %v417_v15  ;;  %v470_v22 = vrot.slane %v331_v16, 1  ;;  %v497_v23 = vrot.slane %v331_v16, 2 }
  0x24   : > { %v1019_v27 = vpack.c.bf16 %v285_v25, %v284_v24  ;;  %v404_v28 = vrot.slane %v1181_v42, 2  ;;  %v405_v29 = vrot.slane %v1184_v43, 2  ;;  %v1023_v37 = vpack.c.bf16 %v287_v36, %v286_v35  ;;  %v289_v43 = vld [vmem:[%s1517_s3 + $0x38] sm:$0xff] }
  0x25   : > { %v1256_v32 = vsel %vm347_vm2, %v469_v17, %v470_v22  ;;  %v1259_v33 = vsel %vm395_vm1, %v496_v18, %v497_v23  ;;  %v277_v39 = vmax.f32 %v269_v26, 0.0  ;;  %v1027_v44 = vpack.c.bf16 %v289_v43, %v288_v41 }
  0x26   : > { %499 = vrot.lane.b32.xlu1 %v400_v40, %s1071_s11  ;;  %474 = vrot.lane.b32.xlu0 %v1187_v45, %s1070_s6  ;;  %v406_v38 = vsel %vm395_vm1, %v404_v28, %v405_v29  ;;  %v255_v40 = vmul.f32 %v1129_v3, %v240_v34 }
  0x27   : > { %1020 = vmatprep.subr.bf16.mxu0 %v1019_v27  ;;  %1032 = vmatprep.subr.bf16.mxu1 %v1019_v27  ;;  %v302_v46 = vrot.slane %v277_v39, 7 }
  0x28   : > { %1022 = vmatpush3.bf16.msra.mxu0 %v1019_v27  ;;  %1037 = vmatpush3.bf16.msra.mxu1 %v1019_v27  ;;  %v270_v3 = vadd.f32 %v1141_v4, %v255_v40 }
  0x29   : > { %1024 = vmatprep.subr.bf16.mxu0 %v1023_v37  ;;  %1033 = vmatprep.subr.bf16.mxu1 %v1023_v37  ;;  %v1292_v48 = vsel %vm315_vm0, 0.0, %v302_v46  ;;  %v327_v4 = vsel %vm315_vm0, %v302_v46, 0.0 }
  0x2a   : > { %423 = vrot.lane.b32.xlu1 %v1203_v61, %s1067_s20  ;;  %377 = vrot.lane.b32.xlu0 %v1206_v62, %s1068_s21  ;;  %v278_v49 = vmax.f32 %v270_v3, 0.0  ;;  %v360_v50 = vrot.slane %v327_v4, 1  ;;  %v407_v56 = vrot.slane %v1292_v48, 2  ;;  %v408_v57 = vrot.slane %v327_v4, 2 }
  0x2c   : > { %1026 = vmatpush3.bf16.msra.mxu0 %v1023_v37  ;;  %1038 = vmatpush3.bf16.msra.mxu1 %v1023_v37  ;;  %v303_v51 = vrot.slane %v278_v49, 7  ;;  %v409_v60 = vsel %vm395_vm1, %v407_v56, %v408_v57 }
  0x2d   : > { %1028 = vmatprep.subr.bf16.mxu0 %v1027_v44  ;;  %1034 = vmatprep.subr.bf16.mxu1 %v1027_v44 }
  0x2e   : > { %523 = vrot.lane.b32.xlu1 %v1162_v30, %s1072_s25  ;;  %501 = vrot.lane.b32.xlu0 %v1203_v61, %s1071_s11  ;;  %v1306_v54 = vsel %vm315_vm0, 0.0, %v303_v51  ;;  %v328_v55 = vsel %vm315_vm0, %v303_v51, 0.0 }
  0x2f   : > { %v362_v58 = vrot.slane %v1306_v54, 1  ;;  %v363_v59 = vrot.slane %v328_v55, 1  ;;  %v411_v63 = vrot.slane %v328_v55, 2 }
  0x30   : > { %1030 = vmatpush3.bf16.msra.mxu0 %v1027_v44  ;;  %1039 = vmatpush3.bf16.msra.mxu1 %v1027_v44 }
  0x31   : > { %1001 = vmatprep.subr.mxu0 %v290_v47  ;;  %1035 = vmatprep.subr.mxu1 %v290_v47 }
  0x32   : > { %448 = vrot.lane.b32.xlu1 %v1181_v42, %s1069_s30  ;;  %425 = vrot.lane.b32.xlu0 %v406_v38, %s1067_s20 }
  0x34   : > { %1002 = vmatpush3.msra.mxu0 %v290_v47  ;;  %1040 = vmatpush3.msra.mxu1 %v290_v47 }
  0x36   : > { %547 = vrot.lane.b32.xlu1 %v1187_v45, %s1073_s7  ;;  %525 = vrot.lane.b32.xlu0 %v1181_v42, %s1072_s25  ;;  %v359_v45 = vrot.slane %v1292_v48, 1 }
  0x38   : > { %v361_v52 = vsel %vm347_vm2, %v359_v45, %v360_v50 }
  0x3a   : > { %476 = vrot.lane.b32.xlu1 %v1206_v62, %s1070_s6  ;;  %450 = vrot.lane.b32.xlu0 %v1292_v48, %s1069_s30 }
  0x3e   : > { %571 = vrot.lane.b32.xlu1 %v1203_v61, %s1074_s10  ;;  %549 = vrot.lane.b32.xlu0 %v1206_v62, %s1073_s7  ;;  %v364_v61 = vsel %vm347_vm2, %v362_v58, %v363_v59  ;;  %v410_v62 = vrot.slane %v1306_v54, 2 }
  0x40   : > { %v412_v6 = vsel %vm395_vm1, %v410_v62, %v411_v63 }
  0x42   : > { %478 = vrot.lane.b32.xlu1 %v361_v52, %s1070_s6  ;;  %379 = vrot.lane.b32.xlu0 %v361_v52, %s1068_s21 }
  0x46   : > { %573 = vrot.lane.b32.xlu1 %v406_v38, %s1074_s10  ;;  %503 = vrot.lane.b32.xlu0 %v406_v38, %s1071_s11 }
  0x4a   : > { %427 = vrot.lane.b32.xlu1 %v409_v60, %s1067_s20  ;;  %381 = vrot.lane.b32.xlu0 %v364_v61, %s1068_s21 }
  0x4e   : > { %527 = vrot.lane.b32.xlu1 %v1292_v48, %s1072_s25  ;;  %505 = vrot.lane.b32.xlu0 %v409_v60, %s1071_s11 }
  0x52   : > { %452 = vrot.lane.b32.xlu1 %v1306_v54, %s1069_s30  ;;  %429 = vrot.lane.b32.xlu0 %v412_v6, %s1067_s20 }
  0x56   : > { %551 = vrot.lane.b32.xlu1 %v361_v52, %s1073_s7  ;;  %529 = vrot.lane.b32.xlu0 %v1306_v54, %s1072_s25 }
  0x5a   : > { %480 = vrot.lane.b32.xlu1 %v364_v61, %s1070_s6  ;;  %454 = vrot.lane.b32.xlu0 %v1197_v53, %s1069_s30 }
  0x5e   : > { %575 = vrot.lane.b32.xlu1 %v409_v60, %s1074_s10  ;;  %553 = vrot.lane.b32.xlu0 %v364_v61, %s1073_s7 }
  0x62   : > { %482 = vrot.lane.b32.xlu1 %v1210_v5, %s1070_s6  ;;  %383 = vrot.lane.b32.xlu0 %v1210_v5, %s1068_s21 }
  0x66   : > { %577 = vrot.lane.b32.xlu1 %v412_v6, %s1074_s10  ;;  %507 = vrot.lane.b32.xlu0 %v412_v6, %s1071_s11 }
  0x6a   : > { %431 = vrot.lane.b32.xlu1 %v1222_v8, %s1067_s20  ;;  %385 = vrot.lane.b32.xlu0 %v1237_v20, %s1068_s21 }
  0x6e   : > { %531 = vrot.lane.b32.xlu1 %v1197_v53, %s1072_s25  ;;  %509 = vrot.lane.b32.xlu0 %v1222_v8, %s1071_s11 }
  0x72   : > { %456 = vrot.lane.b32.xlu1 %v1225_v9, %s1069_s30  ;;  %433 = vrot.lane.b32.xlu0 %v1240_v21, %s1067_s20 }
  0x76   : > { %555 = vrot.lane.b32.xlu1 %v1210_v5, %s1073_s7  ;;  %533 = vrot.lane.b32.xlu0 %v1225_v9, %s1072_s25 }
  0x7a   : > { %484 = vrot.lane.b32.xlu1 %v1237_v20, %s1070_s6  ;;  %458 = vrot.lane.b32.xlu0 %v1229_v11, %s1069_s30  ;;  %v420_v5 = vpop.permute.xlu1 %419  ;;  %v372_v7 = vpop.permute.xlu0 %371  ;;  %s1472_s30 = scalar_lea.vmem %s1518_s4, %s966_s22  ;;  %s953_s22 = sshll.u32 %s1521_s19, 1 }
  0x7b   : > { %s235_s12 = scalar_lea.vmem %s1519_s5, %s953_s22 }
  0x7e   : > { %579 = vrot.lane.b32.xlu1 %v1222_v8, %s1074_s10  ;;  %557 = vrot.lane.b32.xlu0 %v1237_v20, %s1073_s7 }
  0x82   : > { %511 = vrot.lane.b32.xlu1 %v1240_v21, %s1071_s11  ;;  %486 = vrot.lane.b32.xlu0 %v1256_v32, %s1070_s6 }
  0x86   : > { %513 = vrot.lane.b32.xlu1 %v1259_v33, %s1071_s11  ;;  %581 = vrot.lane.b32.xlu0 %v1240_v21, %s1074_s10  ;;  %v596_v21 = vsel %vm595_vm3, 0.0, %v372_v7 }
  0x87   : > { %v605_v23 = vsel %vm604_vm4, %v596_v21, %v420_v5 }
  0x8a   : > { %537 = vrot.lane.b32.xlu1 %v1066_v0, %s1072_s25  ;;  %535 = vrot.lane.b32.xlu0 %v1229_v11, %s1072_s25 }
  0x8c   : > { %v447_v8 = vpop.permute.xlu1 %446  ;;  %v445_v10 = vpop.permute.xlu0 %444 }
  0x8d   : > { %v614_v24 = vsel %vm613_vm5, %v605_v23, %v445_v10 }
  0x8e   : > { %561 = vrot.lane.b32.xlu1 %v1117_v2, %s1073_s7  ;;  %559 = vrot.lane.b32.xlu0 %v1256_v32, %s1073_s7 }
  0x90   : > { %v422_v12 = vpop.permute.xlu1 %421  ;;  %v374_v13 = vpop.permute.xlu0 %373 }
  0x91   : > { %v597_v28 = vsel %vm595_vm3, %v1165_v31, %v374_v13 }
  0x92   : > { %585 = vrot.lane.b32.xlu1 %v1114_v1, %s1074_s10  ;;  %583 = vrot.lane.b32.xlu0 %v1259_v33, %s1074_s10  ;;  %v606_v36 = vsel %vm604_vm4, %v597_v28, %v422_v12 }
  0x93   : > { %v615_v38 = vsel %vm613_vm5, %v606_v36, %v447_v8 }
  0x94   : > { %v376_v0 = vpop.permute.xlu1 %375  ;;  %v473_v14 = vpop.permute.xlu0 %472 }
  0x95   : > { %v623_v27 = vsel %vm622_vm6, %v614_v24, %v473_v14  ;;  %v598_v57 = vsel %vm595_vm3, %v1162_v30, %v376_v0 }
  0x98   : > { %v500_v15 = vpop.permute.xlu1 %499  ;;  %v475_v11 = vpop.permute.xlu0 %474 }
  0x99   : > { %v632_v29 = vsel %vm631_vm7, %v623_v27, %v500_v15  ;;  %v624_v40 = vsel %vm622_vm6, %v615_v38, %v475_v11 }
  0x9c   : > { %v424_v16 = vpop.permute.xlu1 %423  ;;  %v1385_v17 = vpop.permute.xlu0 %377 }
  0x9d   : > { %v607_v58 = vsel %vm604_vm4, %v598_v57, %v424_v16  ;;  %v599_v30 = vsel %vm595_vm3, %v1181_v42, %v1385_v17 }
  0xa0   : > { %v524_v18 = vpop.permute.xlu1 %523  ;;  %v502_v2 = vpop.permute.xlu0 %501 }
  0xa1   : > { %v641_v32 = vsel %vm640_vm8, %v632_v29, %v524_v18  ;;  %v633_v41 = vsel %vm631_vm7, %v624_v40, %v502_v2 }
  0xa4   : > { %v449_v19 = vpop.permute.xlu1 %448  ;;  %v426_v20 = vpop.permute.xlu0 %425 }
  0xa5   : > { %v616_v59 = vsel %vm613_vm5, %v607_v58, %v449_v19  ;;  %v608_v12 = vsel %vm604_vm4, %v599_v30, %v426_v20 }
  0xa8   : > { %v548_v22 = vpop.permute.xlu1 %547  ;;  %v526_v1 = vpop.permute.xlu0 %525 }
  0xa9   : > { %v650_v33 = vsel %vm649_vm9, %v641_v32, %v548_v22  ;;  %v642_v43 = vsel %vm640_vm8, %v633_v41, %v526_v1 }
  0xac   : > { %v477_v25 = vpop.permute.xlu1 %476  ;;  %v451_v26 = vpop.permute.xlu0 %450 }
  0xad   : > { %v625_v62 = vsel %vm622_vm6, %v616_v59, %v477_v25  ;;  %v617_v13 = vsel %vm613_vm5, %v608_v12, %v451_v26 }
  0xb0   : > { %v572_v34 = vpop.permute.xlu1 %571  ;;  %v550_v35 = vpop.permute.xlu0 %549 }
  0xb1   : > { %v659_v37 = vsel %vm658_vm10, %v650_v33, %v572_v34  ;;  %v651_v44 = vsel %vm649_vm9, %v642_v43, %v550_v35 }
  0xb2   : > { %1003 = vmatprep.mubr.msk.f32.mxu0 %vm667_vm11, %v659_v37 }
  0xb4   : > { %v479_v39 = vpop.permute.xlu1 %478  ;;  %v380_v31 = vpop.permute.xlu0 %379 }
  0xb5   : > { %v626_v15 = vsel %vm622_vm6, %v617_v13, %v479_v39  ;;  %v600_v26 = vsel %vm595_vm3, %v1292_v48, %v380_v31 }
  0xb8   : > { %v574_v46 = vpop.permute.xlu1 %573  ;;  %v504_v3 = vpop.permute.xlu0 %503 }
  0xb9   : > { %v660_v47 = vsel %vm658_vm10, %v651_v44, %v574_v46  ;;  %v634_v63 = vsel %vm631_vm7, %v625_v62, %v504_v3 }
  0xba   : > { %1004 = vmatmul.mubr.msk.f32.vlgmr.msra.gmra.mrb[0].mxu0 %vm667_vm11, %v660_v47 }
  0xbc   : > { %v428_v4 = vpop.permute.xlu1 %427  ;;  %v382_v49 = vpop.permute.xlu0 %381 }
  0xbd   : > { %v609_v27 = vsel %vm604_vm4, %v600_v26, %v428_v4  ;;  %v601_v48 = vsel %vm595_vm3, %v1306_v54, %v382_v49 }
  0xc0   : > { %v528_v45 = vpop.permute.xlu1 %527  ;;  %v506_v50 = vpop.permute.xlu0 %505 }
  0xc1   : > { %v643_v6 = vsel %vm640_vm8, %v634_v63, %v528_v45  ;;  %v635_v11 = vsel %vm631_vm7, %v626_v15, %v506_v50 }
  0xc4   : > { %v453_v51 = vpop.permute.xlu1 %452  ;;  %v430_v52 = vpop.permute.xlu0 %429 }
  0xc5   : > { %v618_v28 = vsel %vm613_vm5, %v609_v27, %v453_v51  ;;  %v610_v31 = vsel %vm604_vm4, %v601_v48, %v430_v52 }
  0xc8   : > { %v552_v55 = vpop.permute.xlu1 %551  ;;  %v530_v56 = vpop.permute.xlu0 %529 }
  0xc9   : > { %v652_v5 = vsel %vm649_vm9, %v643_v6, %v552_v55  ;;  %v644_v16 = vsel %vm640_vm8, %v635_v11, %v530_v56 }
  0xcc   : > { %v481_v60 = vpop.permute.xlu1 %480  ;;  %v455_v61 = vpop.permute.xlu0 %454 }
  0xcd   : > { %v627_v33 = vsel %vm622_vm6, %v618_v28, %v481_v60  ;;  %v619_v40 = vsel %vm613_vm5, %v610_v31, %v455_v61 }
  0xd0   : > { %v576_v7 = vpop.permute.xlu1 %575  ;;  %v554_v8 = vpop.permute.xlu0 %553 }
  0xd1   : > { %v661_v10 = vsel %vm658_vm10, %v652_v5, %v576_v7  ;;  %v653_v18 = vsel %vm649_vm9, %v644_v16, %v554_v8 }
  0xd2   : > { %1006 = vmatprep.mubr.msk.f32.mxu0 %vm667_vm11, %v661_v10 }
  0xd4   : > { %v483_v0 = vpop.permute.xlu1 %482  ;;  %v384_v14 = vpop.permute.xlu0 %383 }
  0xd5   : > { %v628_v44 = vsel %vm622_vm6, %v619_v40, %v483_v0  ;;  %v602_v51 = vsel %vm595_vm3, %v1197_v53, %v384_v14 }
  0xd8   : > { %v578_v2 = vpop.permute.xlu1 %577  ;;  %v508_v19 = vpop.permute.xlu0 %507 }
  0xd9   : > { %v662_v42 = vsel %vm658_vm10, %v653_v18, %v578_v2  ;;  %v636_v34 = vsel %vm631_vm7, %v627_v33, %v508_v19 }
  0xda   : > { %1007 = vmatmul.mubr.msk.f32.gmra.mrb[2].mxu0 %vm667_vm11, %v662_v42 }
  0xdc   : > { %v432_v17 = vpop.permute.xlu1 %431  ;;  %v386_v20 = vpop.permute.xlu0 %385 }
  0xdd   : > { %v603_v52 = vsel %vm595_vm3, %v1225_v9, %v386_v20  ;;  %v611_v55 = vsel %vm604_vm4, %v602_v51, %v432_v17 }
  0xe0   : > { %v532_v21 = vpop.permute.xlu1 %531  ;;  %v510_v22 = vpop.permute.xlu0 %509 }
  0xe1   : > { %v645_v35 = vsel %vm640_vm8, %v636_v34, %v532_v21  ;;  %v637_v46 = vsel %vm631_vm7, %v628_v44, %v510_v22 }
  0xe4   : > { %v457_v1 = vpop.permute.xlu1 %456  ;;  %v434_v23 = vpop.permute.xlu0 %433 }
  0xe5   : > { %v612_v56 = vsel %vm604_vm4, %v603_v52, %v434_v23  ;;  %v620_v57 = vsel %vm613_vm5, %v611_v55, %v457_v1 }
  0xe8   : > { %v556_v24 = vpop.permute.xlu1 %555  ;;  %v534_v25 = vpop.permute.xlu0 %533 }
  0xe9   : > { %v654_v36 = vsel %vm649_vm9, %v645_v35, %v556_v24  ;;  %v646_v3 = vsel %vm640_vm8, %v637_v46, %v534_v25 }
  0xec   : > { %v485_v29 = vpop.permute.xlu1 %484  ;;  %v459_v32 = vpop.permute.xlu0 %458 }
  0xed   : > { %v621_v58 = vsel %vm613_vm5, %v612_v56, %v459_v32  ;;  %v629_v61 = vsel %vm622_vm6, %v620_v57, %v485_v29 }
  0xf0   : > { %v580_v37 = vpop.permute.xlu1 %579  ;;  %v558_v38 = vpop.permute.xlu0 %557 }
  0xf1   : > { %v663_v39 = vsel %vm658_vm10, %v654_v36, %v580_v37  ;;  %v655_v47 = vsel %vm649_vm9, %v646_v3, %v558_v38 }
  0xf2   : > { %1009 = vmatprep.mubr.msk.f32.mxu1 %vm667_vm11, %v663_v39 }
  0xf4   : > { %v512_v41 = vpop.permute.xlu1 %511  ;;  %v487_v43 = vpop.permute.xlu0 %486 }
  0xf5   : > { %v630_v62 = vsel %vm622_vm6, %v621_v58, %v487_v43  ;;  %v638_v53 = vsel %vm631_vm7, %v629_v61, %v512_v41 }
  0xf8   : > { %v514_v4 = vpop.permute.xlu1 %513  ;;  %v582_v45 = vpop.permute.xlu0 %581 }
  0xf9   : > { %v664_v54 = vsel %vm658_vm10, %v655_v47, %v582_v45  ;;  %v639_v63 = vsel %vm631_vm7, %v630_v62, %v514_v4 }
  0xfa   : > { %1010 = vmatmul.mubr.msk.f32.vlgmr.msra.gmra.mrb[0].mxu1 %vm667_vm11, %v664_v54 }
  0xfc   : > { %v538_v49 = vpop.permute.xlu1 %537  ;;  %v536_v50 = vpop.permute.xlu0 %535 }
  0xfd   : > { %v648_v9 = vsel %vm640_vm8, %v639_v63, %v538_v49  ;;  %v647_v6 = vsel %vm640_vm8, %v638_v53, %v536_v50 }
 0x100   : > { %v562_v59 = vpop.permute.xlu1 %561  ;;  %v560_v60 = vpop.permute.xlu0 %559 }
 0x101   : > { %v657_v5 = vsel %vm649_vm9, %v648_v9, %v562_v59  ;;  %v656_v7 = vsel %vm649_vm9, %v647_v6, %v560_v60 }
 0x104   : > { %v586_v8 = vpop.permute.xlu1 %585  ;;  %v584_v10 = vpop.permute.xlu0 %583 }
 0x105   : > { %v666_v30 = vsel %vm658_vm10, %v657_v5, %v586_v8  ;;  %v665_v12 = vsel %vm658_vm10, %v656_v7, %v584_v10 }
 0x106   : > { %1012 = vmatprep.mubr.msk.f32.mxu1 %vm667_vm11, %v665_v12 }
 0x107   : > { %1013 = vmatmul.mubr.msk.f32.gmra.mrb[2].mxu1 %vm667_vm11, %v666_v30 }
 0x18d   : > { %v1005_v13 = vpop.f32.mrb[0].mxu0 }
 0x18e   : > { %798 = vst.msk [vmem:[%s1472_s30 + $0x8] sm:$0xff] %vm595_vm3, %v1005_v13  ;;  %v806_v0 = vsel %vm595_vm3, %v1005_v13, 0.0  ;;  %v827_v14 = vmul.f32 %v1005_v13, %v1005_v13  ;;  %v758_v15 = vpop.f32.mrb[1].mxu0 }
 0x18f   : > { %797 = vst.msk [vmem:[%s1472_s30] sm:$0xff] %vm595_vm3, %v758_v15  ;;  %v805_v11 = vsel %vm595_vm3, %v758_v15, 0.0  ;;  %v826_v16 = vmul.f32 %v758_v15, %v758_v15 }
 0x190   : > { %v835_v18 = vsel %vm595_vm3, %v827_v14, 0.0  ;;  %v807_v2 = vadd.f32 %v806_v0, %v805_v11 }
 0x191   : > { %v834_v19 = vsel %vm595_vm3, %v826_v16, 0.0 }
 0x192   : > { %v836_v42 = vadd.f32 %v835_v18, %v834_v19 }
 0x1ad   : > { %v1008_v17 = vpop.f32.mrb[2].mxu0 }
 0x1ae   : > { %800 = vst.msk [vmem:[%s1472_s30 + $0x18] sm:$0xff] %vm595_vm3, %v1008_v17  ;;  %v768_v20 = vpop.f32.mrb[3].mxu0  ;;  %v829_v21 = vmul.f32 %v1008_v17, %v1008_v17  ;;  %v810_v24 = vsel %vm595_vm3, %v1008_v17, 0.0 }
 0x1af   : > { %799 = vst.msk [vmem:[%s1472_s30 + $0x10] sm:$0xff] %vm595_vm3, %v768_v20  ;;  %v808_v22 = vsel %vm595_vm3, %v768_v20, 0.0  ;;  %v828_v1 = vmul.f32 %v768_v20, %v768_v20 }
 0x1b0   : > { %v809_v23 = vadd.f32 %v808_v22, %v807_v2  ;;  %v839_v28 = vsel %vm595_vm3, %v829_v21, 0.0 }
 0x1b1   : > { %v837_v25 = vsel %vm595_vm3, %v828_v1, 0.0 }
 0x1b2   : > { %v811_v26 = vadd.f32 %v810_v24, %v809_v23  ;;  %v838_v27 = vadd.f32 %v837_v25, %v836_v42 }
 0x1b4   : > { %v840_v29 = vadd.f32 %v839_v28, %v838_v27 }
 0x1cd   : > { %v1011_v32 = vpop.f32.mrb[0].mxu1 }
 0x1ce   : > { %802 = vst.msk [vmem:[%s1472_s30 + $0x28] sm:$0xff] %vm595_vm3, %v1011_v32  ;;  %v778_v33 = vpop.f32.mrb[1].mxu1  ;;  %v831_v34 = vmul.f32 %v1011_v32, %v1011_v32  ;;  %v814_v38 = vsel %vm595_vm3, %v1011_v32, 0.0 }
 0x1cf   : > { %801 = vst.msk [vmem:[%s1472_s30 + $0x20] sm:$0xff] %vm595_vm3, %v778_v33  ;;  %v812_v35 = vsel %vm595_vm3, %v778_v33, 0.0  ;;  %v830_v36 = vmul.f32 %v778_v33, %v778_v33 }
 0x1d0   : > { %v813_v37 = vadd.f32 %v812_v35, %v811_v26  ;;  %v843_v40 = vsel %vm595_vm3, %v831_v34, 0.0 }
 0x1d1   : > { %v841_v39 = vsel %vm595_vm3, %v830_v36, 0.0 }
 0x1d2   : > { %v842_v48 = vadd.f32 %v841_v39, %v840_v29  ;;  %v815_v31 = vadd.f32 %v814_v38, %v813_v37 }
 0x1d4   : > { %v844_v41 = vadd.f32 %v843_v40, %v842_v48 }
 0x1da   : > { %v1014_v43 = vpop.f32.mrb[2].mxu1 }
 0x1db   : > { %804 = vst.msk [vmem:[%s1472_s30 + $0x38] sm:$0xff] %vm595_vm3, %v1014_v43  ;;  %v788_v44 = vpop.f32.mrb[3].mxu1  ;;  %v833_v46 = vmul.f32 %v1014_v43, %v1014_v43  ;;  %v818_v45 = vsel %vm595_vm3, %v1014_v43, 0.0 }
 0x1dc   : > { %803 = vst.msk [vmem:[%s1472_s30 + $0x30] sm:$0xff] %vm595_vm3, %v788_v44  ;;  %v816_v3 = vsel %vm595_vm3, %v788_v44, 0.0  ;;  %v832_v47 = vmul.f32 %v788_v44, %v788_v44 }
 0x1dd   : > { %v817_v4 = vadd.f32 %v816_v3, %v815_v31  ;;  %v847_v51 = vsel %vm595_vm3, %v833_v46, 0.0 }
 0x1de   : > { %v845_v54 = vsel %vm595_vm3, %v832_v47, 0.0 }
 0x1df   : > { %v819_v49 = vadd.f32 %v818_v45, %v817_v4  ;;  %v846_v50 = vadd.f32 %v845_v54, %v844_v41 }
 0x1e1   : > { %v820_v52 = vrot.slane %v819_v49, 4  ;;  %v848_v55 = vadd.f32 %v847_v51, %v846_v50 }
 0x1e3   : > { %v821_v56 = vadd.f32 %v820_v52, %v819_v49  ;;  %v849_v57 = vrot.slane %v848_v55, 4 }
 0x1e5   : > { %v822_v58 = vrot.slane %v821_v56, 2  ;;  %v850_v59 = vadd.f32 %v849_v57, %v848_v55 }
 0x1e7   : > { %v823_v60 = vadd.f32 %v822_v58, %v821_v56  ;;  %v851_v61 = vrot.slane %v850_v59, 2 }
 0x1e9   : > { %v824_v62 = vrot.slane %v823_v60, 1  ;;  %v852_v53 = vadd.f32 %v851_v61, %v850_v59 }
 0x1eb   : > { %v853_v63 = vrot.slane %v852_v53, 1  ;;  %v825_v9 = vadd.f32 %v824_v62, %v823_v60 }
 0x1ed   : > { %v854_v6 = vadd.f32 %v853_v63, %v852_v53 }
 0x1ef   : > { %v855_v5 = vsel %vm315_vm0, %v825_v9, %v854_v6 }
 0x1f0   : > { %857 = vst.msk [vmem:[%s235_s12] sm:$0x3] %vm856_vm12, %v855_v5 }
 0x1f1 PF: > { %s16_s18 = sadd.s32 1, %s1064_s18  }
 0x1f2   : > { %p13_p4 = scmp.ge.s32.totalorder %s16_s18, 4  }
 0x1f4   :  { %15 = sbr.rel (!%p13_p4) target bundleno = 1 (0x1), region = 78 }

</bundles_post_ra>
